<compile_context>
chip_gen: v7x
topology: tpu7x:2x2x1
jax: 0.10.0
libtpu: 0.0.40
codegen_flags: <defaults>
</compile_context>

<pallas_src>
import jax
import jax.numpy as jnp
from jax.experimental import pallas as pl
from jax.experimental.pallas import tpu as pltpu

# small synthetic config (DialoGPT-small shrunk to toy sizes)
B, T, D, H, V, L = 2, 8, 32, 2, 64, 2
HD = D // H
FF = 4 * D
VP = ((V + 127) // 128) * 128          # lane-dense (128-multiple) logits width
LN_EPS = 1e-5
NEG_INF = -1e9
SCALE = 1.0 / (HD ** 0.5)


def _layer_norm(x, w, b):
    # w, b are (1, D) and broadcast against (T, D); all f32
    mu = jnp.mean(x, axis=-1, keepdims=True)
    var = jnp.mean((x - mu) ** 2, axis=-1, keepdims=True)
    return (x - mu) * jax.lax.rsqrt(var + LN_EPS) * w + b


def _gelu_new(x):
    # GPT-2 "gelu_new" (tanh approximation), f32
    return 0.5 * x * (1.0 + jnp.tanh(0.7978845608028654 * (x + 0.044715 * x * x * x)))


# ---------------------------------------------------------------------------
# Kernel 1: token/pos embedding carry + L pre-LN transformer blocks + final LN
# grid = (B, L): batch tiles parallel, layers sequential (weights streamed).
# ---------------------------------------------------------------------------
def layers_kernel(emb_ref, bias_ref,
                  ln1w_ref, ln1b_ref, wq_ref, wk_ref, wv_ref,
                  bq_ref, bk_ref, bv_ref, wao_ref, bao_ref,
                  ln2w_ref, ln2b_ref, wfc_ref, bfc_ref, wmo_ref, bmo_ref,
                  lnfw_ref, lnfb_ref,
                  xf_ref, x_ref):
    l = pl.program_id(1)

    # initialize the carried activation at the first layer of this batch tile
    @pl.when(l == 0)
    def _init():
        x_ref[...] = emb_ref[0]                       # (T, D) f32

    x = x_ref[...]                                    # (T, D) f32
    bias = bias_ref[0]                                # (T, T) f32 causal+pad (precomputed)

    # ---- attention (pre-LN), all heads in one batched contraction ----
    h1 = _layer_norm(x, ln1w_ref[0], ln1b_ref[0]).astype(jnp.bfloat16)
    q = jnp.dot(h1, wq_ref[0], preferred_element_type=jnp.float32) + bq_ref[0]
    k = jnp.dot(h1, wk_ref[0], preferred_element_type=jnp.float32) + bk_ref[0]
    v = jnp.dot(h1, wv_ref[0], preferred_element_type=jnp.float32) + bv_ref[0]
    qh = q.reshape(T, H, HD)
    kh = k.reshape(T, H, HD)
    vh = v.reshape(T, H, HD)

    s = jnp.einsum('qhd,khd->hqk', qh, kh,
                   preferred_element_type=jnp.float32) * SCALE + bias[None, :, :]
    s = s - jnp.max(s, axis=-1, keepdims=True)
    e = jnp.exp(s)
    p = e / jnp.sum(e, axis=-1, keepdims=True)        # exact softmax (validation fidelity)
    ctx = jnp.einsum('hqk,khd->qhd', p, vh,
                     preferred_element_type=jnp.float32).reshape(T, D)
    attn = jnp.dot(ctx.astype(jnp.bfloat16), wao_ref[0],
                   preferred_element_type=jnp.float32) + bao_ref[0]
    x = x + attn

    # ---- MLP (pre-LN) ----
    h2 = _layer_norm(x, ln2w_ref[0], ln2b_ref[0]).astype(jnp.bfloat16)
    m = _gelu_new(jnp.dot(h2, wfc_ref[0], preferred_element_type=jnp.float32) + bfc_ref[0])
    x = x + jnp.dot(m.astype(jnp.bfloat16), wmo_ref[0],
                    preferred_element_type=jnp.float32) + bmo_ref[0]
    x_ref[...] = x

    # ---- final LayerNorm only on the last layer step of this batch tile ----
    @pl.when(l == pl.num_programs(1) - 1)
    def _final():
        xf_ref[0] = _layer_norm(x, lnfw_ref[...], lnfb_ref[...])


# ---------------------------------------------------------------------------
# Kernel 2: tied LM head (contract D against wte's D axis) + shifted CE.
# Separate call so wte / logits never occupy VMEM during the layer loop.
# ---------------------------------------------------------------------------
def head_kernel(xf_ref, wte_ref, tgt_ref, logits_ref, loss_ref):
    xf = xf_ref[...]                                              # (BT, D) f32
    # tied LM head: (BT, D) x (VP, D)^T  (no materialized transpose copy)
    logits = jax.lax.dot_general(xf, wte_ref[...], (((1,), (1,)), ((), ())),
                                 preferred_element_type=jnp.float32)   # (BT, VP)
    logits_ref[...] = logits

    vocab_iota = jax.lax.broadcasted_iota(jnp.int32, (B * T, VP), 1)
    logits_m = jnp.where(vocab_iota < V, logits, NEG_INF)         # mask padded vocab cols

    tgt = tgt_ref[...]                                            # (BT, 1) pre-shifted labels
    valid = (tgt != -100).astype(jnp.float32)
    tgt_c = jnp.where(tgt == -100, 0, tgt)
    picked = jnp.sum(jnp.where(vocab_iota == tgt_c, logits_m, 0.0),
                     axis=-1, keepdims=True)                      # (BT, 1)
    mx = jnp.max(logits_m, axis=-1, keepdims=True)
    lse = mx + jnp.log(jnp.sum(jnp.exp(logits_m - mx), axis=-1, keepdims=True))
    nll = (lse - picked) * valid                                  # (BT, 1)
    num = jnp.sum(nll, axis=0, keepdims=True)                     # (1, 1)
    den = jnp.maximum(jnp.sum(valid, axis=0, keepdims=True), 1.0)
    loss_ref[...] = num / den


def init_params(key):
    ks = jax.random.split(key, 10)
    n = lambda k, s: 0.02 * jax.random.normal(k, s, jnp.float32)
    return {
        "wte": n(ks[0], (V, D)),
        "wpe": n(ks[1], (T, D)),
        "ln1w": jnp.ones((L, D), jnp.float32), "ln1b": jnp.zeros((L, D), jnp.float32),
        "wq": n(ks[2], (L, D, D)), "wk": n(ks[3], (L, D, D)), "wv": n(ks[4], (L, D, D)),
        "bq": jnp.zeros((L, D), jnp.float32), "bk": jnp.zeros((L, D), jnp.float32),
        "bv": jnp.zeros((L, D), jnp.float32),
        "wao": n(ks[5], (L, D, D)), "bao": jnp.zeros((L, D), jnp.float32),
        "ln2w": jnp.ones((L, D), jnp.float32), "ln2b": jnp.zeros((L, D), jnp.float32),
        "wfc": n(ks[6], (L, D, FF)), "bfc": jnp.zeros((L, FF), jnp.float32),
        "wmo": n(ks[7], (L, FF, D)), "bmo": jnp.zeros((L, D), jnp.float32),
        "lnfw": jnp.ones((1, D), jnp.float32), "lnfb": jnp.zeros((1, D), jnp.float32),
    }


def gpt2_forward(params, input_ids, attention_mask, labels):
    ids = input_ids.astype(jnp.int32)
    amask = attention_mask.astype(jnp.float32)
    # HF GPT2LMHeadModel shifts labels internally (predict token t+1 from t).
    target = jnp.concatenate(
        [labels[:, 1:], jnp.full((B, 1), -100, labels.dtype)], axis=1)
    target = target.astype(jnp.int32).reshape(B * T, 1)

    # Real gather for token embeddings + position embeddings, combined once (B,T,D).
    emb = (jnp.take(params["wte"], ids.reshape(-1), axis=0).reshape(B, T, D)
           + params["wpe"][None, :, :])

    # Causal + key-padding additive bias built ONCE (not per layer), (B,T,T).
    row = jax.lax.broadcasted_iota(jnp.int32, (T, T), 0)
    col = jax.lax.broadcasted_iota(jnp.int32, (T, T), 1)
    causal = jnp.where(row >= col, 0.0, NEG_INF).astype(jnp.float32)
    bias = causal[None, :, :] + (amask[:, None, :] - 1.0) * 1e9

    bf16 = lambda a: a.astype(jnp.bfloat16)
    v3 = lambda a: a.reshape(L, 1, -1)      # per-layer vectors -> (L, 1, X)

    batch_spec = lambda shp: pl.BlockSpec(shp, lambda b, l: (b, 0, 0))
    layer_spec = lambda shp: pl.BlockSpec(shp, lambda b, l: (l, 0, 0))

    inputs = (
        emb, bias,
        v3(params["ln1w"]), v3(params["ln1b"]),
        bf16(params["wq"]), bf16(params["wk"]), bf16(params["wv"]),
        v3(params["bq"]), v3(params["bk"]), v3(params["bv"]),
        bf16(params["wao"]), v3(params["bao"]),
        v3(params["ln2w"]), v3(params["ln2b"]),
        bf16(params["wfc"]), v3(params["bfc"]),
        bf16(params["wmo"]), v3(params["bmo"]),
        params["lnfw"], params["lnfb"],
    )
    in_specs = [
        batch_spec((1, T, D)),                 # emb
        batch_spec((1, T, T)),                 # causal+pad bias
        layer_spec((1, 1, D)), layer_spec((1, 1, D)),            # ln1 w/b
        layer_spec((1, D, D)), layer_spec((1, D, D)), layer_spec((1, D, D)),  # wq wk wv
        layer_spec((1, 1, D)), layer_spec((1, 1, D)), layer_spec((1, 1, D)),  # bq bk bv
        layer_spec((1, D, D)), layer_spec((1, 1, D)),            # wao bao
        layer_spec((1, 1, D)), layer_spec((1, 1, D)),            # ln2 w/b
        layer_spec((1, D, FF)), layer_spec((1, 1, FF)),          # wfc bfc
        layer_spec((1, FF, D)), layer_spec((1, 1, D)),           # wmo bmo
        pl.BlockSpec((1, D), lambda b, l: (0, 0)),               # lnfw
        pl.BlockSpec((1, D), lambda b, l: (0, 0)),               # lnfb
    ]

    layer_weight_bytes = 2 * (4 * D * D + 2 * D * FF) + 4 * (8 * D + FF)
    cost_layers = pl.CostEstimate(
        flops=B * L * (2 * T * D * (4 * D + 2 * FF) + 4 * H * T * T * HD),
        transcendentals=B * L * (H * T * T + T * FF),
        bytes_accessed=B * L * layer_weight_bytes + B * T * (2 * D + T) * 4,
    )

    xf = pl.pallas_call(
        layers_kernel,
        out_shape=jax.ShapeDtypeStruct((B, T, D), jnp.float32),
        grid_spec=pltpu.PrefetchScalarGridSpec(
            num_scalar_prefetch=0,
            grid=(B, L),
            in_specs=in_specs,
            out_specs=pl.BlockSpec((1, T, D), lambda b, l: (b, 0, 0)),
            scratch_shapes=[pltpu.VMEM((T, D), jnp.float32)],
        ),
        compiler_params=pltpu.CompilerParams(
            dimension_semantics=("parallel", "arbitrary"),
            vmem_limit_bytes=32 * 1024 * 1024,
        ),
        cost_estimate=cost_layers,
    )(*inputs)

    # ---- tied LM head + shifted CE (separate call; vocab padded to VP lanes) ----
    # TODO(synk): at real V=50257 the head needs a vocab-tiled grid axis; at toy
    # scale the whole (VP, D) table fits VMEM in one invocation.
    wte_pad = jnp.zeros((VP, D), jnp.float32).at[:V, :].set(params["wte"])
    cost_head = pl.CostEstimate(
        flops=2 * B * T * D * VP,
        transcendentals=B * T * VP,
        bytes_accessed=(B * T * D + VP * D + B * T * VP + B * T) * 4,
    )
    logits_pad, loss = pl.pallas_call(
        head_kernel,
        out_shape=(jax.ShapeDtypeStruct((B * T, VP), jnp.float32),
                   jax.ShapeDtypeStruct((1, 1), jnp.float32)),
        cost_estimate=cost_head,
    )(xf.reshape(B * T, D), wte_pad, target)

    return loss[0, 0], logits_pad[:, :V].reshape(B, T, V)


if __name__ == "__main__":
    key = jax.random.PRNGKey(0)
    pkey, ikey = jax.random.split(key)
    params = init_params(pkey)

    input_ids = jax.random.randint(ikey, (B, T), 0, V, dtype=jnp.int32)
    attention_mask = jnp.array([[1.0] * T,
                                [1.0] * (T - 2) + [0.0, 0.0]], dtype=jnp.float32)
    labels = jnp.where(attention_mask > 0.5, input_ids, -100).astype(jnp.int32)

    loss, logits = jax.jit(gpt2_forward)(params, input_ids, attention_mask, labels)
    jax.block_until_ready((loss, logits))
    assert logits.shape == (B, T, V)
    assert bool(jnp.isfinite(loss))
    # TODO(synk): the `generate()` (labels is None) branch is autoregressive decoding
    # with dynamic control flow / tokenizer plumbing and is not kernelized here.
    print("KERNEL_OK")
</pallas_src>

<mosaic_0001>
module attributes {stable_mosaic.version = 11 : i64} {
  func.func @layers_kernel(%arg0: i32, %arg1: i32, %arg2: memref<1x8x32xf32, #tpu.memory_space<vmem>>, %arg3: memref<1x8x8xf32, #tpu.memory_space<vmem>>, %arg4: memref<1x1x32xf32, #tpu.memory_space<vmem>>, %arg5: memref<1x1x32xf32, #tpu.memory_space<vmem>>, %arg6: memref<1x32x32xbf16, #tpu.memory_space<vmem>>, %arg7: memref<1x32x32xbf16, #tpu.memory_space<vmem>>, %arg8: memref<1x32x32xbf16, #tpu.memory_space<vmem>>, %arg9: memref<1x1x32xf32, #tpu.memory_space<vmem>>, %arg10: memref<1x1x32xf32, #tpu.memory_space<vmem>>, %arg11: memref<1x1x32xf32, #tpu.memory_space<vmem>>, %arg12: memref<1x32x32xbf16, #tpu.memory_space<vmem>>, %arg13: memref<1x1x32xf32, #tpu.memory_space<vmem>>, %arg14: memref<1x1x32xf32, #tpu.memory_space<vmem>>, %arg15: memref<1x1x32xf32, #tpu.memory_space<vmem>>, %arg16: memref<1x32x128xbf16, #tpu.memory_space<vmem>>, %arg17: memref<1x1x128xf32, #tpu.memory_space<vmem>>, %arg18: memref<1x128x32xbf16, #tpu.memory_space<vmem>>, %arg19: memref<1x1x32xf32, #tpu.memory_space<vmem>>, %arg20: memref<1x32xf32, #tpu.memory_space<vmem>>, %arg21: memref<1x32xf32, #tpu.memory_space<vmem>>, %arg22: memref<1x8x32xf32, #tpu.memory_space<vmem>>, %arg23: memref<8x32xf32, #tpu.memory_space<vmem>>) attributes {dimension_semantics = [#tpu.dimension_semantics<parallel>, #tpu.dimension_semantics<arbitrary>], iteration_bounds = array<i64: 2, 2>, scalar_prefetch = 0 : i64, scratch_operands = 1 : i64, tpu.core_type = #tpu.core_type<tc>, window_params = [{transform_indices = @transform_0, window_bounds = array<i64: 1, 8, 32>}, {transform_indices = @transform_1, window_bounds = array<i64: 1, 8, 8>}, {transform_indices = @transform_2, window_bounds = array<i64: 1, 1, 32>}, {transform_indices = @transform_3, window_bounds = array<i64: 1, 1, 32>}, {transform_indices = @transform_4, window_bounds = array<i64: 1, 32, 32>}, {transform_indices = @transform_5, window_bounds = array<i64: 1, 32, 32>}, {transform_indices = @transform_6, window_bounds = array<i64: 1, 32, 32>}, {transform_indices = @transform_7, window_bounds = array<i64: 1, 1, 32>}, {transform_indices = @transform_8, window_bounds = array<i64: 1, 1, 32>}, {transform_indices = @transform_9, window_bounds = array<i64: 1, 1, 32>}, {transform_indices = @transform_10, window_bounds = array<i64: 1, 32, 32>}, {transform_indices = @transform_11, window_bounds = array<i64: 1, 1, 32>}, {transform_indices = @transform_12, window_bounds = array<i64: 1, 1, 32>}, {transform_indices = @transform_13, window_bounds = array<i64: 1, 1, 32>}, {transform_indices = @transform_14, window_bounds = array<i64: 1, 32, 128>}, {transform_indices = @transform_15, window_bounds = array<i64: 1, 1, 128>}, {transform_indices = @transform_16, window_bounds = array<i64: 1, 128, 32>}, {transform_indices = @transform_17, window_bounds = array<i64: 1, 1, 32>}, {pipeline_mode = #tpu.pipeline_mode<synchronous>, transform_indices = @transform_18, window_bounds = array<i64: 1, 32>}, {pipeline_mode = #tpu.pipeline_mode<synchronous>, transform_indices = @transform_19, window_bounds = array<i64: 1, 32>}, {transform_indices = @transform_20, window_bounds = array<i64: 1, 8, 32>}]} {
    %c0_i32 = arith.constant 0 : i32
    %0 = arith.cmpi eq, %arg1, %c0_i32 : i32
    %1 = arith.extui %0 : i1 to i32
    %c0_i32_0 = arith.constant 0 : i32
    %2 = arith.cmpi ne, %1, %c0_i32_0 : i32
    scf.if %2 {
      %c0_80 = arith.constant 0 : index
      %c0_81 = arith.constant 0 : index
      %c0_82 = arith.constant 0 : index
      %144 = vector.load %arg2[%c0_80, %c0_81, %c0_82] : memref<1x8x32xf32, #tpu.memory_space<vmem>>, vector<1x8x32xf32>
      %145 = vector.shape_cast %144 : vector<1x8x32xf32> to vector<8x32xf32>
      %c0_83 = arith.constant 0 : index
      %c0_84 = arith.constant 0 : index
      %146 = vector.load %arg23[%c0_83, %c0_84] : memref<8x32xf32, #tpu.memory_space<vmem>>, vector<8x32xf32>
      tpu.vector_store %arg23[%c0_83, %c0_84], %145 {strides = array<i32>} : memref<8x32xf32, #tpu.memory_space<vmem>>, vector<8x32xf32>,
    } else {
    }
    %c0 = arith.constant 0 : index
    %c0_1 = arith.constant 0 : index
    %3 = vector.load %arg23[%c0, %c0_1] : memref<8x32xf32, #tpu.memory_space<vmem>>, vector<8x32xf32>
    %c0_2 = arith.constant 0 : index
    %c0_3 = arith.constant 0 : index
    %c0_4 = arith.constant 0 : index
    %4 = vector.load %arg3[%c0_2, %c0_3, %c0_4] : memref<1x8x8xf32, #tpu.memory_space<vmem>>, vector<1x8x8xf32>
    %5 = vector.shape_cast %4 : vector<1x8x8xf32> to vector<8x8xf32>
    %c0_5 = arith.constant 0 : index
    %c0_6 = arith.constant 0 : index
    %c0_7 = arith.constant 0 : index
    %6 = vector.load %arg4[%c0_5, %c0_6, %c0_7] : memref<1x1x32xf32, #tpu.memory_space<vmem>>, vector<1x1x32xf32>
    %7 = vector.shape_cast %6 : vector<1x1x32xf32> to vector<1x32xf32>
    %c0_8 = arith.constant 0 : index
    %c0_9 = arith.constant 0 : index
    %c0_10 = arith.constant 0 : index
    %8 = vector.load %arg5[%c0_8, %c0_9, %c0_10] : memref<1x1x32xf32, #tpu.memory_space<vmem>>, vector<1x1x32xf32>
    %9 = vector.shape_cast %8 : vector<1x1x32xf32> to vector<1x32xf32>
    %cst = arith.constant dense<0.000000e+00> : vector<8xf32>
    %10 = vector.multi_reduction <add>, %3, %cst [1] : vector<8x32xf32> to vector<8xf32>
    %11 = vector.shape_cast %10 : vector<8xf32> to vector<8x1xf32>
    %cst_11 = arith.constant 3.200000e+01 : f32
    %12 = vector.broadcast %cst_11 : f32 to vector<8x1xf32>
    %13 = arith.divf %11, %12 : vector<8x1xf32>
    %14 = vector.broadcast %13 : vector<8x1xf32> to vector<8x32xf32>
    %15 = arith.subf %3, %14 : vector<8x32xf32>
    %16 = arith.mulf %15, %15 : vector<8x32xf32>
    %cst_12 = arith.constant dense<0.000000e+00> : vector<8xf32>
    %17 = vector.multi_reduction <add>, %16, %cst_12 [1] : vector<8x32xf32> to vector<8xf32>
    %18 = vector.shape_cast %17 : vector<8xf32> to vector<8x1xf32>
    %cst_13 = arith.constant 3.200000e+01 : f32
    %19 = vector.broadcast %cst_13 : f32 to vector<8x1xf32>
    %20 = arith.divf %18, %19 : vector<8x1xf32>
    %21 = vector.broadcast %13 : vector<8x1xf32> to vector<8x32xf32>
    %22 = arith.subf %3, %21 : vector<8x32xf32>
    %cst_14 = arith.constant 9.99999974E-6 : f32
    %23 = vector.broadcast %cst_14 : f32 to vector<8x1xf32>
    %24 = arith.addf %20, %23 : vector<8x1xf32>
    %25 = math.rsqrt %24 : vector<8x1xf32>
    %26 = vector.broadcast %25 : vector<8x1xf32> to vector<8x32xf32>
    %27 = arith.mulf %22, %26 : vector<8x32xf32>
    %28 = vector.broadcast %7 : vector<1x32xf32> to vector<8x32xf32>
    %29 = arith.mulf %27, %28 : vector<8x32xf32>
    %30 = vector.broadcast %9 : vector<1x32xf32> to vector<8x32xf32>
    %31 = arith.addf %29, %30 : vector<8x32xf32>
    %32 = arith.truncf %31 : vector<8x32xf32> to vector<8x32xbf16>
    %c0_15 = arith.constant 0 : index
    %c0_16 = arith.constant 0 : index
    %c0_17 = arith.constant 0 : index
    %33 = vector.load %arg6[%c0_15, %c0_16, %c0_17] : memref<1x32x32xbf16, #tpu.memory_space<vmem>>, vector<1x32x32xbf16>
    %34 = vector.shape_cast %33 : vector<1x32x32xbf16> to vector<32x32xbf16>
    %cst_18 = arith.constant dense<0.000000e+00> : vector<8x32xf32>
    %35 = tpu.matmul %32, %34, %cst_18 {dimension_numbers = #tpu.dot_dimension_numbers<[1], [0], [0], [1], [0, 0, 1, 1], [], []>} : vector<8x32xbf16>, vector<32x32xbf16>, vector<8x32xf32> -> vector<8x32xf32>
    %c0_19 = arith.constant 0 : index
    %c0_20 = arith.constant 0 : index
    %c0_21 = arith.constant 0 : index
    %36 = vector.load %arg9[%c0_19, %c0_20, %c0_21] : memref<1x1x32xf32, #tpu.memory_space<vmem>>, vector<1x1x32xf32>
    %37 = vector.shape_cast %36 : vector<1x1x32xf32> to vector<1x32xf32>
    %38 = vector.broadcast %37 : vector<1x32xf32> to vector<8x32xf32>
    %39 = arith.addf %35, %38 : vector<8x32xf32>
    %c0_22 = arith.constant 0 : index
    %c0_23 = arith.constant 0 : index
    %c0_24 = arith.constant 0 : index
    %40 = vector.load %arg7[%c0_22, %c0_23, %c0_24] : memref<1x32x32xbf16, #tpu.memory_space<vmem>>, vector<1x32x32xbf16>
    %41 = vector.shape_cast %40 : vector<1x32x32xbf16> to vector<32x32xbf16>
    %cst_25 = arith.constant dense<0.000000e+00> : vector<8x32xf32>
    %42 = tpu.matmul %32, %41, %cst_25 {dimension_numbers = #tpu.dot_dimension_numbers<[1], [0], [0], [1], [0, 0, 1, 1], [], []>} : vector<8x32xbf16>, vector<32x32xbf16>, vector<8x32xf32> -> vector<8x32xf32>
    %c0_26 = arith.constant 0 : index
    %c0_27 = arith.constant 0 : index
    %c0_28 = arith.constant 0 : index
    %43 = vector.load %arg10[%c0_26, %c0_27, %c0_28] : memref<1x1x32xf32, #tpu.memory_space<vmem>>, vector<1x1x32xf32>
    %44 = vector.shape_cast %43 : vector<1x1x32xf32> to vector<1x32xf32>
    %45 = vector.broadcast %44 : vector<1x32xf32> to vector<8x32xf32>
    %46 = arith.addf %42, %45 : vector<8x32xf32>
    %c0_29 = arith.constant 0 : index
    %c0_30 = arith.constant 0 : index
    %c0_31 = arith.constant 0 : index
    %47 = vector.load %arg8[%c0_29, %c0_30, %c0_31] : memref<1x32x32xbf16, #tpu.memory_space<vmem>>, vector<1x32x32xbf16>
    %48 = vector.shape_cast %47 : vector<1x32x32xbf16> to vector<32x32xbf16>
    %cst_32 = arith.constant dense<0.000000e+00> : vector<8x32xf32>
    %49 = tpu.matmul %32, %48, %cst_32 {dimension_numbers = #tpu.dot_dimension_numbers<[1], [0], [0], [1], [0, 0, 1, 1], [], []>} : vector<8x32xbf16>, vector<32x32xbf16>, vector<8x32xf32> -> vector<8x32xf32>
    %c0_33 = arith.constant 0 : index
    %c0_34 = arith.constant 0 : index
    %c0_35 = arith.constant 0 : index
    %50 = vector.load %arg11[%c0_33, %c0_34, %c0_35] : memref<1x1x32xf32, #tpu.memory_space<vmem>>, vector<1x1x32xf32>
    %51 = vector.shape_cast %50 : vector<1x1x32xf32> to vector<1x32xf32>
    %52 = vector.broadcast %51 : vector<1x32xf32> to vector<8x32xf32>
    %53 = arith.addf %49, %52 : vector<8x32xf32>
    %54 = vector.shape_cast %39 : vector<8x32xf32> to vector<8x2x16xf32>
    %55 = vector.shape_cast %46 : vector<8x32xf32> to vector<8x2x16xf32>
    %56 = vector.shape_cast %53 : vector<8x32xf32> to vector<8x2x16xf32>
    "tpu.trace_start"() <{level = 10 : i32, message = "qhd,khd->hqk"}> : () -> ()
    %cst_36 = arith.constant dense<0.000000e+00> : vector<2x8x8xf32>
    %57 = tpu.matmul %54, %55, %cst_36 {dimension_numbers = #tpu.dot_dimension_numbers<[2], [2], [0], [0], [0, 1, 0, 0, 1, 0], [1], [1]>} : vector<8x2x16xf32>, vector<8x2x16xf32>, vector<2x8x8xf32> -> vector<2x8x8xf32>
    "tpu.trace_stop"() : () -> ()
    %cst_37 = arith.constant 2.500000e-01 : f32
    %58 = vector.broadcast %cst_37 : f32 to vector<2x8x8xf32>
    %59 = arith.mulf %57, %58 : vector<2x8x8xf32>
    %60 = vector.shape_cast %5 : vector<8x8xf32> to vector<1x8x8xf32>
    %61 = vector.broadcast %60 : vector<1x8x8xf32> to vector<2x8x8xf32>
    %62 = arith.addf %59, %61 : vector<2x8x8xf32>
    %cst_38 = arith.constant dense<0xFF800000> : vector<2x8xf32>
    %63 = vector.multi_reduction <maximumf>, %62, %cst_38 [2] : vector<2x8x8xf32> to vector<2x8xf32>
    %64 = vector.shape_cast %63 : vector<2x8xf32> to vector<2x8x1xf32>
    %65 = vector.broadcast %64 : vector<2x8x1xf32> to vector<2x8x8xf32>
    %66 = arith.subf %62, %65 : vector<2x8x8xf32>
    %67 = math.exp %66 : vector<2x8x8xf32>
    %cst_39 = arith.constant dense<0.000000e+00> : vector<2x8xf32>
    %68 = vector.multi_reduction <add>, %67, %cst_39 [2] : vector<2x8x8xf32> to vector<2x8xf32>
    %69 = vector.shape_cast %68 : vector<2x8xf32> to vector<2x8x1xf32>
    %70 = vector.broadcast %69 : vector<2x8x1xf32> to vector<2x8x8xf32>
    %71 = arith.divf %67, %70 : vector<2x8x8xf32>
    "tpu.trace_start"() <{level = 10 : i32, message = "hqk,khd->qhd"}> : () -> ()
    %cst_40 = arith.constant dense<0.000000e+00> : vector<2x16x8xf32>
    %72 = tpu.matmul %56, %71, %cst_40 {dimension_numbers = #tpu.dot_dimension_numbers<[0], [2], [2], [1], [0, 1, 0, 2, 1, 1], [1], [0]>} : vector<8x2x16xf32>, vector<2x8x8xf32>, vector<2x16x8xf32> -> vector<2x16x8xf32>
    %73 = tpu.transpose %72, [2, 0, 1] : vector<2x16x8xf32> -> vector<8x2x16xf32>
    "tpu.trace_stop"() : () -> ()
    %74 = vector.shape_cast %73 : vector<8x2x16xf32> to vector<8x32xf32>
    %75 = arith.truncf %74 : vector<8x32xf32> to vector<8x32xbf16>
    %c0_41 = arith.constant 0 : index
    %c0_42 = arith.constant 0 : index
    %c0_43 = arith.constant 0 : index
    %76 = vector.load %arg12[%c0_41, %c0_42, %c0_43] : memref<1x32x32xbf16, #tpu.memory_space<vmem>>, vector<1x32x32xbf16>
    %77 = vector.shape_cast %76 : vector<1x32x32xbf16> to vector<32x32xbf16>
    %cst_44 = arith.constant dense<0.000000e+00> : vector<8x32xf32>
    %78 = tpu.matmul %75, %77, %cst_44 {dimension_numbers = #tpu.dot_dimension_numbers<[1], [0], [0], [1], [0, 0, 1, 1], [], []>} : vector<8x32xbf16>, vector<32x32xbf16>, vector<8x32xf32> -> vector<8x32xf32>
    %c0_45 = arith.constant 0 : index
    %c0_46 = arith.constant 0 : index
    %c0_47 = arith.constant 0 : index
    %79 = vector.load %arg13[%c0_45, %c0_46, %c0_47] : memref<1x1x32xf32, #tpu.memory_space<vmem>>, vector<1x1x32xf32>
    %80 = vector.shape_cast %79 : vector<1x1x32xf32> to vector<1x32xf32>
    %81 = vector.broadcast %80 : vector<1x32xf32> to vector<8x32xf32>
    %82 = arith.addf %78, %81 : vector<8x32xf32>
    %83 = arith.addf %3, %82 : vector<8x32xf32>
    %c0_48 = arith.constant 0 : index
    %c0_49 = arith.constant 0 : index
    %c0_50 = arith.constant 0 : index
    %84 = vector.load %arg14[%c0_48, %c0_49, %c0_50] : memref<1x1x32xf32, #tpu.memory_space<vmem>>, vector<1x1x32xf32>
    %85 = vector.shape_cast %84 : vector<1x1x32xf32> to vector<1x32xf32>
    %c0_51 = arith.constant 0 : index
    %c0_52 = arith.constant 0 : index
    %c0_53 = arith.constant 0 : index
    %86 = vector.load %arg15[%c0_51, %c0_52, %c0_53] : memref<1x1x32xf32, #tpu.memory_space<vmem>>, vector<1x1x32xf32>
    %87 = vector.shape_cast %86 : vector<1x1x32xf32> to vector<1x32xf32>
    %cst_54 = arith.constant dense<0.000000e+00> : vector<8xf32>
    %88 = vector.multi_reduction <add>, %83, %cst_54 [1] : vector<8x32xf32> to vector<8xf32>
    %89 = vector.shape_cast %88 : vector<8xf32> to vector<8x1xf32>
    %cst_55 = arith.constant 3.200000e+01 : f32
    %90 = vector.broadcast %cst_55 : f32 to vector<8x1xf32>
    %91 = arith.divf %89, %90 : vector<8x1xf32>
    %92 = vector.broadcast %91 : vector<8x1xf32> to vector<8x32xf32>
    %93 = arith.subf %83, %92 : vector<8x32xf32>
    %94 = arith.mulf %93, %93 : vector<8x32xf32>
    %cst_56 = arith.constant dense<0.000000e+00> : vector<8xf32>
    %95 = vector.multi_reduction <add>, %94, %cst_56 [1] : vector<8x32xf32> to vector<8xf32>
    %96 = vector.shape_cast %95 : vector<8xf32> to vector<8x1xf32>
    %cst_57 = arith.constant 3.200000e+01 : f32
    %97 = vector.broadcast %cst_57 : f32 to vector<8x1xf32>
    %98 = arith.divf %96, %97 : vector<8x1xf32>
    %99 = vector.broadcast %91 : vector<8x1xf32> to vector<8x32xf32>
    %100 = arith.subf %83, %99 : vector<8x32xf32>
    %cst_58 = arith.constant 9.99999974E-6 : f32
    %101 = vector.broadcast %cst_58 : f32 to vector<8x1xf32>
    %102 = arith.addf %98, %101 : vector<8x1xf32>
    %103 = math.rsqrt %102 : vector<8x1xf32>
    %104 = vector.broadcast %103 : vector<8x1xf32> to vector<8x32xf32>
    %105 = arith.mulf %100, %104 : vector<8x32xf32>
    %106 = vector.broadcast %85 : vector<1x32xf32> to vector<8x32xf32>
    %107 = arith.mulf %105, %106 : vector<8x32xf32>
    %108 = vector.broadcast %87 : vector<1x32xf32> to vector<8x32xf32>
    %109 = arith.addf %107, %108 : vector<8x32xf32>
    %110 = arith.truncf %109 : vector<8x32xf32> to vector<8x32xbf16>
    %c0_59 = arith.constant 0 : index
    %c0_60 = arith.constant 0 : index
    %c0_61 = arith.constant 0 : index
    %111 = vector.load %arg16[%c0_59, %c0_60, %c0_61] : memref<1x32x128xbf16, #tpu.memory_space<vmem>>, vector<1x32x128xbf16>
    %112 = vector.shape_cast %111 : vector<1x32x128xbf16> to vector<32x128xbf16>
    %cst_62 = arith.constant dense<0.000000e+00> : vector<8x128xf32>
    %113 = tpu.matmul %110, %112, %cst_62 {dimension_numbers = #tpu.dot_dimension_numbers<[1], [0], [0], [1], [0, 0, 1, 1], [], []>} : vector<8x32xbf16>, vector<32x128xbf16>, vector<8x128xf32> -> vector<8x128xf32>
    %c0_63 = arith.constant 0 : index
    %c0_64 = arith.constant 0 : index
    %c0_65 = arith.constant 0 : index
    %114 = vector.load %arg17[%c0_63, %c0_64, %c0_65] : memref<1x1x128xf32, #tpu.memory_space<vmem>>, vector<1x1x128xf32>
    %115 = vector.shape_cast %114 : vector<1x1x128xf32> to vector<1x128xf32>
    %116 = vector.broadcast %115 : vector<1x128xf32> to vector<8x128xf32>
    %117 = arith.addf %113, %116 : vector<8x128xf32>
    %cst_66 = arith.constant 5.000000e-01 : f32
    %118 = vector.broadcast %cst_66 : f32 to vector<8x128xf32>
    %119 = arith.mulf %118, %117 : vector<8x128xf32>
    %cst_67 = arith.constant 4.471500e-02 : f32
    %120 = vector.broadcast %cst_67 : f32 to vector<8x128xf32>
    %121 = arith.mulf %120, %117 : vector<8x128xf32>
    %122 = arith.mulf %121, %117 : vector<8x128xf32>
    %123 = arith.mulf %122, %117 : vector<8x128xf32>
    %124 = arith.addf %117, %123 : vector<8x128xf32>
    %cst_68 = arith.constant 0.797884583 : f32
    %125 = vector.broadcast %cst_68 : f32 to vector<8x128xf32>
    %126 = arith.mulf %125, %124 : vector<8x128xf32>
    %127 = math.tanh %126 : vector<8x128xf32>
    %cst_69 = arith.constant 1.000000e+00 : f32
    %128 = vector.broadcast %cst_69 : f32 to vector<8x128xf32>
    %129 = arith.addf %128, %127 : vector<8x128xf32>
    %130 = arith.mulf %119, %129 : vector<8x128xf32>
    %131 = arith.truncf %130 : vector<8x128xf32> to vector<8x128xbf16>
    %c0_70 = arith.constant 0 : index
    %c0_71 = arith.constant 0 : index
    %c0_72 = arith.constant 0 : index
    %132 = vector.load %arg18[%c0_70, %c0_71, %c0_72] : memref<1x128x32xbf16, #tpu.memory_space<vmem>>, vector<1x128x32xbf16>
    %133 = vector.shape_cast %132 : vector<1x128x32xbf16> to vector<128x32xbf16>
    %cst_73 = arith.constant dense<0.000000e+00> : vector<8x32xf32>
    %134 = tpu.matmul %131, %133, %cst_73 {dimension_numbers = #tpu.dot_dimension_numbers<[1], [0], [0], [1], [0, 0, 1, 1], [], []>} : vector<8x128xbf16>, vector<128x32xbf16>, vector<8x32xf32> -> vector<8x32xf32>
    %135 = arith.addf %83, %134 : vector<8x32xf32>
    %c0_74 = arith.constant 0 : index
    %c0_75 = arith.constant 0 : index
    %c0_76 = arith.constant 0 : index
    %136 = vector.load %arg19[%c0_74, %c0_75, %c0_76] : memref<1x1x32xf32, #tpu.memory_space<vmem>>, vector<1x1x32xf32>
    %137 = vector.shape_cast %136 : vector<1x1x32xf32> to vector<1x32xf32>
    %138 = vector.broadcast %137 : vector<1x32xf32> to vector<8x32xf32>
    %139 = arith.addf %135, %138 : vector<8x32xf32>
    %c0_77 = arith.constant 0 : index
    %c0_78 = arith.constant 0 : index
    %140 = vector.load %arg23[%c0_77, %c0_78] : memref<8x32xf32, #tpu.memory_space<vmem>>, vector<8x32xf32>
    tpu.vector_store %arg23[%c0_77, %c0_78], %139 {strides = array<i32>} : memref<8x32xf32, #tpu.memory_space<vmem>>, vector<8x32xf32>,
    %c1_i32 = arith.constant 1 : i32
    %141 = arith.cmpi eq, %arg1, %c1_i32 : i32
    %142 = arith.extui %141 : i1 to i32
    %c0_i32_79 = arith.constant 0 : i32
    %143 = arith.cmpi ne, %142, %c0_i32_79 : i32
    scf.if %143 {
      %c0_80 = arith.constant 0 : index
      %c0_81 = arith.constant 0 : index
      %144 = vector.load %arg20[%c0_80, %c0_81] : memref<1x32xf32, #tpu.memory_space<vmem>>, vector<1x32xf32>
      %c0_82 = arith.constant 0 : index
      %c0_83 = arith.constant 0 : index
      %145 = vector.load %arg21[%c0_82, %c0_83] : memref<1x32xf32, #tpu.memory_space<vmem>>, vector<1x32xf32>
      %cst_84 = arith.constant dense<0.000000e+00> : vector<8xf32>
      %146 = vector.multi_reduction <add>, %139, %cst_84 [1] : vector<8x32xf32> to vector<8xf32>
      %147 = vector.shape_cast %146 : vector<8xf32> to vector<8x1xf32>
      %cst_85 = arith.constant 3.200000e+01 : f32
      %148 = vector.broadcast %cst_85 : f32 to vector<8x1xf32>
      %149 = arith.divf %147, %148 : vector<8x1xf32>
      %150 = vector.broadcast %149 : vector<8x1xf32> to vector<8x32xf32>
      %151 = arith.subf %139, %150 : vector<8x32xf32>
      %152 = arith.mulf %151, %151 : vector<8x32xf32>
      %cst_86 = arith.constant dense<0.000000e+00> : vector<8xf32>
      %153 = vector.multi_reduction <add>, %152, %cst_86 [1] : vector<8x32xf32> to vector<8xf32>
      %154 = vector.shape_cast %153 : vector<8xf32> to vector<8x1xf32>
      %cst_87 = arith.constant 3.200000e+01 : f32
      %155 = vector.broadcast %cst_87 : f32 to vector<8x1xf32>
      %156 = arith.divf %154, %155 : vector<8x1xf32>
      %157 = vector.broadcast %149 : vector<8x1xf32> to vector<8x32xf32>
      %158 = arith.subf %139, %157 : vector<8x32xf32>
      %cst_88 = arith.constant 9.99999974E-6 : f32
      %159 = vector.broadcast %cst_88 : f32 to vector<8x1xf32>
      %160 = arith.addf %156, %159 : vector<8x1xf32>
      %161 = math.rsqrt %160 : vector<8x1xf32>
      %162 = vector.broadcast %161 : vector<8x1xf32> to vector<8x32xf32>
      %163 = arith.mulf %158, %162 : vector<8x32xf32>
      %164 = vector.broadcast %144 : vector<1x32xf32> to vector<8x32xf32>
      %165 = arith.mulf %163, %164 : vector<8x32xf32>
      %166 = vector.broadcast %145 : vector<1x32xf32> to vector<8x32xf32>
      %167 = arith.addf %165, %166 : vector<8x32xf32>
      %c0_89 = arith.constant 0 : index
      %c0_90 = arith.constant 0 : index
      %c0_91 = arith.constant 0 : index
      %168 = vector.load %arg22[%c0_89, %c0_90, %c0_91] : memref<1x8x32xf32, #tpu.memory_space<vmem>>, vector<1x8x32xf32>
      %169 = vector.shape_cast %168 : vector<1x8x32xf32> to vector<8x32xf32>
      %170 = vector.shape_cast %167 : vector<8x32xf32> to vector<1x8x32xf32>
      tpu.vector_store %arg22[%c0_89, %c0_90, %c0_91], %170 {strides = array<i32>} : memref<1x8x32xf32, #tpu.memory_space<vmem>>, vector<1x8x32xf32>,
    } else {
    }
    return
  }
  func.func @transform_0(%arg0: i32, %arg1: i32) -> (i32, i32, i32) {
    %c0_i32 = arith.constant 0 : i32
    %c0_i32_0 = arith.constant 0 : i32
    %c0_i32_1 = arith.constant 0 : i32
    return %arg0, %c0_i32, %c0_i32_0 : i32, i32, i32
  }
  func.func @transform_1(%arg0: i32, %arg1: i32) -> (i32, i32, i32) {
    %c0_i32 = arith.constant 0 : i32
    %c0_i32_0 = arith.constant 0 : i32
    %c0_i32_1 = arith.constant 0 : i32
    return %arg0, %c0_i32, %c0_i32_0 : i32, i32, i32
  }
  func.func @transform_2(%arg0: i32, %arg1: i32) -> (i32, i32, i32) {
    %c0_i32 = arith.constant 0 : i32
    %c0_i32_0 = arith.constant 0 : i32
    %c0_i32_1 = arith.constant 0 : i32
    return %arg1, %c0_i32, %c0_i32_0 : i32, i32, i32
  }
  func.func @transform_3(%arg0: i32, %arg1: i32) -> (i32, i32, i32) {
    %c0_i32 = arith.constant 0 : i32
    %c0_i32_0 = arith.constant 0 : i32
    %c0_i32_1 = arith.constant 0 : i32
    return %arg1, %c0_i32, %c0_i32_0 : i32, i32, i32
  }
  func.func @transform_4(%arg0: i32, %arg1: i32) -> (i32, i32, i32) {
    %c0_i32 = arith.constant 0 : i32
    %c0_i32_0 = arith.constant 0 : i32
    %c0_i32_1 = arith.constant 0 : i32
    return %arg1, %c0_i32, %c0_i32_0 : i32, i32, i32
  }
  func.func @transform_5(%arg0: i32, %arg1: i32) -> (i32, i32, i32) {
    %c0_i32 = arith.constant 0 : i32
    %c0_i32_0 = arith.constant 0 : i32
    %c0_i32_1 = arith.constant 0 : i32
    return %arg1, %c0_i32, %c0_i32_0 : i32, i32, i32
  }
  func.func @transform_6(%arg0: i32, %arg1: i32) -> (i32, i32, i32) {
    %c0_i32 = arith.constant 0 : i32
    %c0_i32_0 = arith.constant 0 : i32
    %c0_i32_1 = arith.constant 0 : i32
    return %arg1, %c0_i32, %c0_i32_0 : i32, i32, i32
  }
  func.func @transform_7(%arg0: i32, %arg1: i32) -> (i32, i32, i32) {
    %c0_i32 = arith.constant 0 : i32
    %c0_i32_0 = arith.constant 0 : i32
    %c0_i32_1 = arith.constant 0 : i32
    return %arg1, %c0_i32, %c0_i32_0 : i32, i32, i32
  }
  func.func @transform_8(%arg0: i32, %arg1: i32) -> (i32, i32, i32) {
    %c0_i32 = arith.constant 0 : i32
    %c0_i32_0 = arith.constant 0 : i32
    %c0_i32_1 = arith.constant 0 : i32
    return %arg1, %c0_i32, %c0_i32_0 : i32, i32, i32
  }
  func.func @transform_9(%arg0: i32, %arg1: i32) -> (i32, i32, i32) {
    %c0_i32 = arith.constant 0 : i32
    %c0_i32_0 = arith.constant 0 : i32
    %c0_i32_1 = arith.constant 0 : i32
    return %arg1, %c0_i32, %c0_i32_0 : i32, i32, i32
  }
  func.func @transform_10(%arg0: i32, %arg1: i32) -> (i32, i32, i32) {
    %c0_i32 = arith.constant 0 : i32
    %c0_i32_0 = arith.constant 0 : i32
    %c0_i32_1 = arith.constant 0 : i32
    return %arg1, %c0_i32, %c0_i32_0 : i32, i32, i32
  }
  func.func @transform_11(%arg0: i32, %arg1: i32) -> (i32, i32, i32) {
    %c0_i32 = arith.constant 0 : i32
    %c0_i32_0 = arith.constant 0 : i32
    %c0_i32_1 = arith.constant 0 : i32
    return %arg1, %c0_i32, %c0_i32_0 : i32, i32, i32
  }
  func.func @transform_12(%arg0: i32, %arg1: i32) -> (i32, i32, i32) {
    %c0_i32 = arith.constant 0 : i32
    %c0_i32_0 = arith.constant 0 : i32
    %c0_i32_1 = arith.constant 0 : i32
    return %arg1, %c0_i32, %c0_i32_0 : i32, i32, i32
  }
  func.func @transform_13(%arg0: i32, %arg1: i32) -> (i32, i32, i32) {
    %c0_i32 = arith.constant 0 : i32
    %c0_i32_0 = arith.constant 0 : i32
    %c0_i32_1 = arith.constant 0 : i32
    return %arg1, %c0_i32, %c0_i32_0 : i32, i32, i32
  }
  func.func @transform_14(%arg0: i32, %arg1: i32) -> (i32, i32, i32) {
    %c0_i32 = arith.constant 0 : i32
    %c0_i32_0 = arith.constant 0 : i32
    %c0_i32_1 = arith.constant 0 : i32
    return %arg1, %c0_i32, %c0_i32_0 : i32, i32, i32
  }
  func.func @transform_15(%arg0: i32, %arg1: i32) -> (i32, i32, i32) {
    %c0_i32 = arith.constant 0 : i32
    %c0_i32_0 = arith.constant 0 : i32
    %c0_i32_1 = arith.constant 0 : i32
    return %arg1, %c0_i32, %c0_i32_0 : i32, i32, i32
  }
  func.func @transform_16(%arg0: i32, %arg1: i32) -> (i32, i32, i32) {
    %c0_i32 = arith.constant 0 : i32
    %c0_i32_0 = arith.constant 0 : i32
    %c0_i32_1 = arith.constant 0 : i32
    return %arg1, %c0_i32, %c0_i32_0 : i32, i32, i32
  }
  func.func @transform_17(%arg0: i32, %arg1: i32) -> (i32, i32, i32) {
    %c0_i32 = arith.constant 0 : i32
    %c0_i32_0 = arith.constant 0 : i32
    %c0_i32_1 = arith.constant 0 : i32
    return %arg1, %c0_i32, %c0_i32_0 : i32, i32, i32
  }
  func.func @transform_18(%arg0: i32, %arg1: i32) -> (i32, i32) {
    %c0_i32 = arith.constant 0 : i32
    %c0_i32_0 = arith.constant 0 : i32
    %c0_i32_1 = arith.constant 0 : i32
    return %c0_i32, %c0_i32_0 : i32, i32
  }
  func.func @transform_19(%arg0: i32, %arg1: i32) -> (i32, i32) {
    %c0_i32 = arith.constant 0 : i32
    %c0_i32_0 = arith.constant 0 : i32
    %c0_i32_1 = arith.constant 0 : i32
    return %c0_i32, %c0_i32_0 : i32, i32
  }
  func.func @transform_20(%arg0: i32, %arg1: i32) -> (i32, i32, i32) {
    %c0_i32 = arith.constant 0 : i32
    %c0_i32_0 = arith.constant 0 : i32
    %c0_i32_1 = arith.constant 0 : i32
    return %arg0, %c0_i32, %c0_i32_0 : i32, i32, i32
  }
}

module attributes {stable_mosaic.version = 11 : i64} {
  func.func @head_kernel(%arg0: memref<16x32xf32, #tpu.memory_space<vmem>>, %arg1: memref<128x32xf32, #tpu.memory_space<vmem>>, %arg2: memref<16x1xi32, #tpu.memory_space<vmem>>, %arg3: memref<16x128xf32, #tpu.memory_space<vmem>>, %arg4: memref<1x1xf32, #tpu.memory_space<vmem>>) attributes {dimension_semantics = [], scalar_prefetch = 0 : i64, scratch_operands = 0 : i64, tpu.core_type = #tpu.core_type<tc>} {
    %c0 = arith.constant 0 : index
    %c0_0 = arith.constant 0 : index
    %0 = vector.load %arg0[%c0, %c0_0] : memref<16x32xf32, #tpu.memory_space<vmem>>, vector<16x32xf32>
    %c0_1 = arith.constant 0 : index
    %c0_2 = arith.constant 0 : index
    %1 = vector.load %arg1[%c0_1, %c0_2] : memref<128x32xf32, #tpu.memory_space<vmem>>, vector<128x32xf32>
    %cst = arith.constant dense<0.000000e+00> : vector<16x128xf32>
    %2 = tpu.matmul %0, %1, %cst {dimension_numbers = #tpu.dot_dimension_numbers<[1], [1], [0], [0], [0, 0, 1, 0], [], []>} : vector<16x32xf32>, vector<128x32xf32>, vector<16x128xf32> -> vector<16x128xf32>
    %c0_3 = arith.constant 0 : index
    %c0_4 = arith.constant 0 : index
    %3 = vector.load %arg3[%c0_3, %c0_4] : memref<16x128xf32, #tpu.memory_space<vmem>>, vector<16x128xf32>
    tpu.vector_store %arg3[%c0_3, %c0_4], %2 {strides = array<i32>} : memref<16x128xf32, #tpu.memory_space<vmem>>, vector<16x128xf32>,
    %4 = tpu.iota {dimensions = array<i32: 1>} : vector<16x128xi32>
    %c64_i32 = arith.constant 64 : i32
    %5 = vector.broadcast %c64_i32 : i32 to vector<16x128xi32>
    %6 = arith.cmpi slt, %4, %5 : vector<16x128xi32>
    %cst_5 = arith.constant -1.000000e+09 : f32
    %7 = vector.broadcast %cst_5 : f32 to vector<16x128xf32>
    %8 = arith.select %6, %2, %7 : vector<16x128xi1>, vector<16x128xf32>
    %c0_6 = arith.constant 0 : index
    %c0_7 = arith.constant 0 : index
    %9 = vector.load %arg2[%c0_6, %c0_7] : memref<16x1xi32, #tpu.memory_space<vmem>>, vector<16x1xi32>
    %c-100_i32 = arith.constant -100 : i32
    %10 = vector.broadcast %c-100_i32 : i32 to vector<16x1xi32>
    %11 = arith.cmpi ne, %9, %10 : vector<16x1xi32>
    %12 = arith.extui %11 : vector<16x1xi1> to vector<16x1xi32>
    %13 = arith.sitofp %12 : vector<16x1xi32> to vector<16x1xf32>
    %c-100_i32_8 = arith.constant -100 : i32
    %14 = vector.broadcast %c-100_i32_8 : i32 to vector<16x1xi32>
    %15 = arith.cmpi eq, %9, %14 : vector<16x1xi32>
    %c0_i32 = arith.constant 0 : i32
    %16 = vector.broadcast %c0_i32 : i32 to vector<16x1xi32>
    %17 = arith.select %15, %16, %9 : vector<16x1xi1>, vector<16x1xi32>
    %18 = vector.broadcast %17 : vector<16x1xi32> to vector<16x128xi32>
    %19 = arith.cmpi eq, %4, %18 : vector<16x128xi32>
    %cst_9 = arith.constant 0.000000e+00 : f32
    %20 = vector.broadcast %cst_9 : f32 to vector<16x128xf32>
    %21 = arith.select %19, %8, %20 : vector<16x128xi1>, vector<16x128xf32>
    %cst_10 = arith.constant dense<0.000000e+00> : vector<16xf32>
    %22 = vector.multi_reduction <add>, %21, %cst_10 [1] : vector<16x128xf32> to vector<16xf32>
    %23 = vector.shape_cast %22 : vector<16xf32> to vector<16x1xf32>
    %cst_11 = arith.constant dense<0xFF800000> : vector<16xf32>
    %24 = vector.multi_reduction <maximumf>, %8, %cst_11 [1] : vector<16x128xf32> to vector<16xf32>
    %25 = vector.shape_cast %24 : vector<16xf32> to vector<16x1xf32>
    %26 = vector.broadcast %25 : vector<16x1xf32> to vector<16x128xf32>
    %27 = arith.subf %8, %26 : vector<16x128xf32>
    %28 = math.exp %27 : vector<16x128xf32>
    %cst_12 = arith.constant dense<0.000000e+00> : vector<16xf32>
    %29 = vector.multi_reduction <add>, %28, %cst_12 [1] : vector<16x128xf32> to vector<16xf32>
    %30 = vector.shape_cast %29 : vector<16xf32> to vector<16x1xf32>
    %31 = math.log %30 : vector<16x1xf32>
    %32 = arith.addf %25, %31 : vector<16x1xf32>
    %33 = arith.subf %32, %23 : vector<16x1xf32>
    %34 = arith.mulf %33, %13 : vector<16x1xf32>
    %cst_13 = arith.constant dense<0.000000e+00> : vector<1xf32>
    %35 = vector.multi_reduction <add>, %34, %cst_13 [0] : vector<16x1xf32> to vector<1xf32>
    %36 = vector.shape_cast %35 : vector<1xf32> to vector<1x1xf32>
    %cst_14 = arith.constant dense<0.000000e+00> : vector<1xf32>
    %37 = vector.multi_reduction <add>, %13, %cst_14 [0] : vector<16x1xf32> to vector<1xf32>
    %38 = vector.shape_cast %37 : vector<1xf32> to vector<1x1xf32>
    %cst_15 = arith.constant 1.000000e+00 : f32
    %39 = vector.broadcast %cst_15 : f32 to vector<1x1xf32>
    %40 = arith.maximumf %38, %39 : vector<1x1xf32>
    %41 = arith.divf %36, %40 : vector<1x1xf32>
    %c0_16 = arith.constant 0 : index
    %c0_17 = arith.constant 0 : index
    %42 = vector.load %arg4[%c0_16, %c0_17] : memref<1x1xf32, #tpu.memory_space<vmem>>, vector<1x1xf32>
    tpu.vector_store %arg4[%c0_16, %c0_17], %41 {strides = array<i32>} : memref<1x1xf32, #tpu.memory_space<vmem>>, vector<1x1xf32>,
    return
  }
}

</mosaic_0001>

<bundles_post_ra>
// kernel: gpt2_forward.3
= control target key start
LH: loop header
LB: loop body
LE: loop exit
PB: predicated region body
PF: predicated region fallthrough
CT: control target
= control target key end

     0   :  { %vm35_vm0 = vcmask 261120   ;;  %v424_v6 = vmov 0   ;;  %s584_s0 = inlined_call_operand.vmem [shape: f32[16,32], index: 0, kind: input, shape index: {}]   ;;  %s585_s1 = inlined_call_operand.vmem [shape: f32[128,32], index: 1, kind: input, shape index: {}]   ;;  %s586_s2 = inlined_call_operand.vmem [shape: s32[16,1], index: 2, kind: input, shape index: {}]   ;;  %s587_s3 = inlined_call_operand.vmem [shape: f32[16,128], index: 3, kind: output, shape index: {0}]   ;;  %s588_s4 = inlined_call_operand.hbm [shape: f32[1,1], index: 4, kind: output, shape index: {1}]  }
   0x1   :  { %v19_v0 = vld [vmem:[%s585_s1] sm:$0xff]  ;;  %v20_v1 = vld [vmem:[%s585_s1 + $0x8] sm:$0xff]  ;;  %v21_v2 = vld [vmem:[%s585_s1 + $0x10] sm:$0xff]  ;;  %388 = vset.pattern.permute.xlu1 %v424_v6  ;;  %389 = vset.pattern.permute.xlu0 %v424_v6 }
   0x2   :  { %v337_v3 = vpack.c.bf16 %v20_v1, %v19_v0  ;;  %vm463_vm1 = vmpackc.low %vm35_vm0, %vm35_vm0  ;;  %v22_v5 = vld [vmem:[%s585_s1 + $0x18] sm:$0xff]  ;;  %v23_v8 = vld [vmem:[%s585_s1 + $0x20] sm:$0xff] }
   0x3   :  { %v343_v7 = vpack.c.bf16 %v22_v5, %v21_v2  ;;  %v17_v9 = vld [vmem:[%s584_s0] sm:$0xff]  ;;  %v24_v10 = vld [vmem:[%s585_s1 + $0x28] sm:$0xff] }
   0x4   :  { %339 = vmatprep.subr.msk.bf16.mxu0 %vm463_vm1, %v337_v3  ;;  %334 = vmatprep.mubr.msk.f32.mxu0 %vm35_vm0, %v17_v9  ;;  %v489_v11 = vld [vmem:[%s586_s2] sm:$0xff]  ;;  %v494_v12 = vld [vmem:[%s586_s2 + $0x8] sm:$0xff] }
   0x5   :  { %342 = vmatpush3.bf16.xpose.msk.msra.mxu0 %vm463_vm1, %v337_v3  ;;  %vm180_vm2 = vcmp.eq.s32.totalorder %v489_v11, 4294967196  ;;  %vm181_vm3 = vcmp.eq.s32.totalorder %v494_v12, 4294967196 }
   0x6   :  { %345 = vmatprep.subr.msk.bf16.mxu0 %vm463_vm1, %v343_v7 }
   0x7   :  { %10 = vsyncpa [#allocation3], 0  ;;  %v182_v13 = vsel %vm180_vm2, 0, %v489_v11  ;;  %v349_v14 = vpack.c.bf16 %v24_v10, %v23_v8  ;;  %v183_v15 = vsel %vm181_vm3, 0, %v494_v12  ;;  %v25_v16 = vld [vmem:[%s585_s1 + $0x30] sm:$0xff]  ;;  %v26_v17 = vld [vmem:[%s585_s1 + $0x38] sm:$0xff]  ;;  %v167_v32 = vlaneseq }
   0x8   :  { %185 = vperm.xlu1 %388, %v182_v13   ;;  %v355_v18 = vpack.c.bf16 %v26_v17, %v25_v16  ;;  %v27_v19 = vld [vmem:[%s585_s1 + $0x40] sm:$0xff]  ;;  %v28_v20 = vld [vmem:[%s585_s1 + $0x48] sm:$0xff]  ;;  %v29_v22 = vld [vmem:[%s585_s1 + $0x50] sm:$0xff]  ;;  %vm174_vm7 = vcmp.ne.s32.totalorder %v489_v11, 4294967196  ;;  %vm175_vm8 = vcmp.ne.s32.totalorder %v494_v12, 4294967196  ;;  %v425_v50 = vmov 0.0  }
   0x9   :  { %v361_v21 = vpack.c.bf16 %v28_v20, %v27_v19  ;;  %v30_v23 = vld [vmem:[%s585_s1 + $0x58] sm:$0xff]  ;;  %v31_v25 = vld [vmem:[%s585_s1 + $0x60] sm:$0xff]  ;;  %v32_v26 = vld [vmem:[%s585_s1 + $0x68] sm:$0xff]  ;;  %v168_v33 = vand.u32 127, %v167_v32  ;;  %v282_v51 = vsel %vm174_vm7, 1.0, %v425_v50  ;;  %vm222_vm9 = vcmask 7168  }
   0xa   :  { %v367_v24 = vpack.c.bf16 %v30_v23, %v29_v22  ;;  %v373_v27 = vpack.c.bf16 %v32_v26, %v31_v25  ;;  %v33_v28 = vld [vmem:[%s585_s1 + $0x70] sm:$0xff]  ;;  %v34_v29 = vld [vmem:[%s585_s1 + $0x78] sm:$0xff]  ;;  %v18_v31 = vld [vmem:[%s584_s0 + $0x8] sm:$0xff]  ;;  %v283_v52 = vsel %vm175_vm8, 1.0, %v425_v50  ;;  %v232_v53 = vsel %vm222_vm9, %v282_v51, 0.0  ;;  %s426_s0 = smov [#allocation2]  }
   0xb   :  { %v379_v30 = vpack.c.bf16 %v34_v29, %v33_v28  ;;  %vm169_vm4 = vcmp.lt.s32.totalorder %v168_v33, 64  ;;  %v233_v54 = vsel %vm222_vm9, %v283_v52, 0.0  ;;  %vm244_vm10 = vcmask 0  }
   0xc   :  { %188 = vperm.xlu1 %388, %v183_v15   ;;  %v234_v55 = vadd.f32 %v233_v54, %v232_v53 }
   0xd   :  { %348 = vmatpush3.bf16.xpose.msk.msra.mxu0 %vm463_vm1, %v343_v7 }
   0xe   :  { %351 = vmatprep.subr.msk.bf16.mxu0 %vm463_vm1, %v349_v14  ;;  %v235_v56 = vrot.slane %v234_v55, 4 }
  0x10   :  { %v236_v58 = vadd.f32 %v235_v56, %v234_v55 }
  0x12   :  { %v237_v60 = vrot.slane %v236_v58, 2 }
  0x14   :  { %v238_v61 = vadd.f32 %v237_v60, %v236_v58 }
  0x15   :  { %354 = vmatpush3.bf16.xpose.msk.msra.mxu0 %vm463_vm1, %v349_v14 }
  0x16   :  { %357 = vmatprep.subr.msk.bf16.mxu0 %vm463_vm1, %v355_v18  ;;  %v239_v2 = vrot.slane %v238_v61, 1 }
  0x18   :  { %v240_v7 = vadd.f32 %v239_v2, %v238_v61 }
  0x1a   :  { %v241_v11 = vmax.f32 %v240_v7, 1.0 }
  0x1d   :  { %360 = vmatpush3.bf16.xpose.msk.msra.mxu0 %vm463_vm1, %v355_v18 }
  0x1e   :  { %363 = vmatprep.subr.msk.bf16.mxu0 %vm463_vm1, %v361_v21 }
  0x25   :  { %366 = vmatpush3.bf16.xpose.msk.msra.mxu0 %vm463_vm1, %v361_v21 }
  0x26   :  { %369 = vmatprep.subr.msk.bf16.mxu0 %vm463_vm1, %v367_v24 }
  0x2d   :  { %372 = vmatpush3.bf16.xpose.msk.msra.mxu0 %vm463_vm1, %v367_v24 }
  0x2e   :  { %375 = vmatprep.subr.msk.bf16.mxu0 %vm463_vm1, %v373_v27 }
  0x35   :  { %378 = vmatpush3.bf16.xpose.msk.msra.mxu0 %vm463_vm1, %v373_v27 }
  0x36   :  { %381 = vmatprep.subr.msk.bf16.mxu0 %vm463_vm1, %v379_v30 }
  0x3d   :  { %384 = vmatpush3.bf16.xpose.msk.msra.mxu0 %vm463_vm1, %v379_v30 }
  0x44   :  { %335 = vmatmul.mubr.msk.f32.vlgmr.msra.gmra.mrb[0].mxu0 %vm35_vm0, %v18_v31 }
  0x87   :  { %v186_v44 = vpop.permute.xlu1 %185 }
  0x88   :  { %vm190_vm5 = vcmp.eq.s32.totalorder %v168_v33, %v186_v44 }
  0x8b   :  { %v189_v46 = vpop.permute.xlu1 %188 }
  0x8c   :  { %vm191_vm6 = vcmp.eq.s32.totalorder %v168_v33, %v189_v46 }
 0x117   :  { %v336_v34 = vpop.f32.mrb[0].mxu0 }
 0x118   :  { %166 = vst [vmem:[%s587_s3 + $0x8] sm:$0xff] %v336_v34  ;;  %v156_v35 = vpop.f32.mrb[1].mxu0  ;;  %v171_v37 = vsel %vm169_vm4, %v336_v34, -1e+09 }
 0x119   :  { %165 = vst [vmem:[%s587_s3] sm:$0xff] %v156_v35  ;;  %v170_v36 = vsel %vm169_vm4, %v156_v35, -1e+09  ;;  %v193_v49 = vsel %vm191_vm6, %v171_v37, 0.0  ;;  %s254_s3 = sshll.u32 %s426_s0, 4  ;;  %s255_s3 = int_to_ptr.vmem [resolvable:$true] %s254_s3 }
 0x11a   :  { %198 = vmax.xlane.f32.xlu0 %v170_v36  ;;  %v192_v48 = vsel %vm190_vm5, %v170_v36, 0.0  ;;  %s400_s5 = scalar_lea.vmem %s255_s3, 16  ;;  %s404_s6 = scalar_lea.vmem %s255_s3, 32 }
 0x11b   :  { %p401_p0 = scmp.ne.s32.totalorder %s255_s3, %s400_s5  ;;  %p405_p1 = scmp.lt.s32.totalorder %s255_s3, %s255_s3 }
 0x11c   :  { %p406_p2 = scmp.lt.s32.totalorder %s404_s6, %s400_s5 }
 0x11e   :  { %200 = vmax.xlane.f32.xlu0 %v171_v37  ;;  %p407_p3 = por %p406_p2, %p405_p1 }
 0x120   :  { %p408_p4 = pnand %p407_p3, %p401_p0 }
 0x1a7   :  { %v199_v38 = vpop.xlane.xlu0 %198 }
 0x1a8   :  { %v202_v39 = vsub.f32 %v170_v36, %v199_v38 }
 0x1aa   :  { %v204_v40 = vmul.f32 1.442695, %v202_v39 }
 0x1ab   :  { %v201_v41 = vpop.xlane.xlu0 %200 }
 0x1ac   :  { %390 = vpow2.f32 %v204_v40  ;;  %v203_v42 = vsub.f32 %v171_v37, %v201_v41 }
 0x1ae   :  { %v206_v43 = vmul.f32 1.442695, %v203_v42 }
 0x1b0   :  { %392 = vpow2.f32 %v206_v43 }
 0x1b6   :  { %v391_v45 = vpop.eup %390 }
 0x1b7   :  { %208 = vadd.xlane.f32.xlu0 %v391_v45 }
 0x1ba   :  { %v393_v47 = vpop.eup %392 }
 0x1bb   :  { %210 = vadd.xlane.f32.xlu1 %v393_v47  ;;  %194 = vadd.xlane.f32.xlu0 %v192_v48 }
 0x1bf   :  { %196 = vadd.xlane.f32.xlu0 %v193_v49 }
 0x244   :  { %v209_v57 = vpop.xlane.xlu0 %208 }
 0x245   :  { %394 = vlog2.f32 %v209_v57 }
 0x248   :  { %v211_v59 = vpop.xlane.xlu1 %210  ;;  %v195_v0 = vpop.xlane.xlu0 %194 }
 0x249   :  { %396 = vlog2.f32 %v211_v59 }
 0x24a   :  { %398 = vrcp.f32 %v241_v11 }
 0x24c   :  { %v197_v8 = vpop.xlane.xlu0 %196 }
 0x24f   :  { %v395_v62 = vpop.eup %394 }
 0x250   :  { %v213_v63 = vmul.f32 0.6931472, %v395_v62 }
 0x252   :  { %v216_v1 = vadd.f32 %v213_v63, %v199_v38 }
 0x253   :  { %v397_v3 = vpop.eup %396 }
 0x254   :  { %v215_v4 = vmul.f32 0.6931472, %v397_v3  ;;  %v218_v5 = vsub.f32 %v216_v1, %v195_v0  ;;  %v399_v21 = vpop.eup %398 }
 0x256   :  { %v217_v6 = vadd.f32 %v215_v4, %v201_v41  ;;  %v220_v9 = vmul.f32 %v282_v51, %v218_v5 }
 0x258   :  { %v219_v10 = vsub.f32 %v217_v6, %v197_v8  ;;  %v223_v13 = vsel %vm222_vm9, %v220_v9, 0.0 }
 0x25a   :  { %v221_v12 = vmul.f32 %v283_v52, %v219_v10 }
 0x25c   :  { %v224_v14 = vsel %vm222_vm9, %v221_v12, 0.0 }
 0x25d   :  { %v225_v15 = vadd.f32 %v224_v14, %v223_v13 }
 0x25f   :  { %v226_v16 = vrot.slane %v225_v15, 4 }
 0x261   :  { %v227_v17 = vadd.f32 %v226_v16, %v225_v15 }
 0x263   :  { %v228_v18 = vrot.slane %v227_v17, 2 }
 0x265   :  { %v229_v19 = vadd.f32 %v228_v18, %v227_v17 }
 0x267   :  { %v230_v20 = vrot.slane %v229_v19, 1 }
 0x269   :  { %v231_v22 = vadd.f32 %v230_v20, %v229_v19 }
 0x26b   :  { %v243_v23 = vmul.f32 %v399_v21, %v231_v22 }
 0x26d   :  { %245 = vst.msk [vmem:[#allocation2] sm:$0x1] %vm244_vm10, %v243_v23 }
 0x26e   :  { %411 = shalt.err (!%p408_p4)
}
 0x26f   :  { %s412_s8 = scalar_lea.hbm %s588_s4, 16 }
 0x270   :  { %p413_p5 = scmp.ne.s32.totalorder %s588_s4, %s412_s8  ;;  %p416_p6 = scmp.lt.u32.totalorder %s412_s8, %s588_s4 }
 0x272   :  { %p418_p7 = pnand %p416_p6, %p413_p5 }
 0x274   :  { %421 = shalt.err (!%p418_p7)
}
 0x275   :  { %257 = dma.vmem_to_hbm [thread:$0]  %s255_s3, 16, %s588_s4, [#allocation3]  }
 0x276   :  { %422 = dma.done.wait [#allocation3], 16  }
 0x277   :  { %423 = vsyncadd [#allocation3], 4294967280 }
 0x278   :  { %263 = vsyncpa [#allocation3], 1 }

// kernel: gpt2_forward.2
= control target key start
LH: loop header
LB: loop body
LE: loop exit
PB: predicated region body
PF: predicated region fallthrough
CT: control target
= control target key end

     0   :  { %s2808_s22 = smov 0   ;;  %s2810_s23 = smov 0   ;;  %s3106_s0 = inlined_call_operand.vmem [shape: f32[2,8,32], index: 0, kind: input, shape index: {}]   ;;  %s3107_s1 = inlined_call_operand.vmem [shape: f32[2,8,8], index: 1, kind: input, shape index: {}]   ;;  %s3108_s2 = inlined_call_operand.vmem [shape: f32[2,1,32], index: 2, kind: input, shape index: {}]   ;;  %s3109_s3 = inlined_call_operand.vmem [shape: f32[2,1,32], index: 3, kind: input, shape index: {}]   ;;  %s3110_s4 = inlined_call_operand.vmem [shape: bf16[2,32,32], index: 4, kind: input, shape index: {}]   ;;  %s3111_s5 = inlined_call_operand.vmem [shape: bf16[2,32,32], index: 5, kind: input, shape index: {}]   ;;  %s3112_s6 = inlined_call_operand.vmem [shape: bf16[2,32,32], index: 6, kind: input, shape index: {}]   ;;  %s3113_s7 = inlined_call_operand.vmem [shape: f32[2,1,32], index: 7, kind: input, shape index: {}]   ;;  %s3114_s8 = inlined_call_operand.vmem [shape: f32[2,1,32], index: 8, kind: input, shape index: {}]   ;;  %s3115_s9 = inlined_call_operand.vmem [shape: f32[2,1,32], index: 9, kind: input, shape index: {}]   ;;  %s3116_s10 = inlined_call_operand.vmem [shape: bf16[2,32,32], index: 10, kind: input, shape index: {}]   ;;  %s3117_s11 = inlined_call_operand.vmem [shape: f32[2,1,32], index: 11, kind: input, shape index: {}]   ;;  %s3118_s12 = inlined_call_operand.vmem [shape: f32[2,1,32], index: 12, kind: input, shape index: {}]   ;;  %s3119_s13 = inlined_call_operand.vmem [shape: f32[2,1,32], index: 13, kind: input, shape index: {}]   ;;  %s3120_s14 = inlined_call_operand.vmem [shape: bf16[2,32,128], index: 14, kind: input, shape index: {}]   ;;  %s3121_s15 = inlined_call_operand.vmem [shape: f32[2,1,128], index: 15, kind: input, shape index: {}]   ;;  %s3122_s16 = inlined_call_operand.vmem [shape: bf16[2,128,32], index: 16, kind: input, shape index: {}]   ;;  %s3123_s17 = inlined_call_operand.vmem [shape: f32[2,1,32], index: 17, kind: input, shape index: {}]   ;;  %s3124_s18 = inlined_call_operand.vmem [shape: f32[1,32], index: 18, kind: input, shape index: {}]   ;;  %s3125_s19 = inlined_call_operand.vmem [shape: f32[1,32], index: 19, kind: input, shape index: {}]   ;;  %s3126_s20 = inlined_call_operand.vmem [shape: f32[2,8,32], index: 20, kind: output, shape index: {}]  }
   0x1   :  { %3131 = sst [smem:[#allocation9_spill]] %s3106_s0  ;;  %s2812_s24 = smov 0  }
   0x2   :  { %3132 = sst [smem:[#allocation10_spill]] %s3107_s1  ;;  %s2806_s1 = smov 0  }
   0x3   :  { %3133 = sst [smem:[#allocation11_spill]] %s3108_s2  ;;  %s2814_s2 = smov 0  }
   0x4   :  { %3134 = sst [smem:[#allocation12_spill]] %s3109_s3 }
   0x5   :  { %3135 = sst [smem:[#allocation13_spill]] %s3110_s4 }
   0x6   :  { %3136 = sst [smem:[#allocation14_spill]] %s3111_s5 }
   0x7   :  { %3137 = sst [smem:[#allocation15_spill]] %s3112_s6 }
   0x8   :  { %3138 = sst [smem:[#allocation16_spill]] %s3113_s7 }
   0x9   :  { %3139 = sst [smem:[#allocation17_spill]] %s3116_s10 }
   0xa   :  { %3140 = sst [smem:[#allocation18_spill]] %s3117_s11 }
   0xb   :  { %3141 = sst [smem:[#allocation19_spill]] %s3119_s13 }
   0xc   :  { %3142 = sst [smem:[#allocation20_spill]] %s3122_s16 }
   0xd   :  { %3143 = sst [smem:[#allocation21_spill]] %s3123_s17 }
   0xe   :  { %3144 = sst [smem:[#allocation22_spill]] %s3124_s18 }
   0xf   :  { %3145 = sst [smem:[#allocation23_spill]] %s3125_s19 }
  0x10   :  { %3146 = sst [smem:[#allocation24_spill]] %s3126_s20 }
  0x11 LB: > { %3147 = sst [smem:[#allocation3_spill]] %s2676_s1  ;;  %s39_s25 = sadd.s32 1, %s2684_s23  ;;  %s2692_s2 = sphi %s2814_s2, %s30_s2   ;;  %s2688_s24 = sphi %s2812_s24, %s3192_s24   ;;  %s2684_s23 = sphi %s2810_s23, %s3191_s23   ;;  %s2680_s22 = sphi %s2808_s22, %s3190_s22   ;;  %s2676_s1 = sphi %s2806_s1, %s3189_s1  }
  0x12   : > { %3148 = sst [smem:[#allocation4_spill]] %s2684_s23  ;;  %s42_s3 = sadd.s32 1, %s2688_s24 }
  0x13   : > { %3149 = sst [smem:[#allocation5_spill]] %s2688_s24  ;;  %p40_p0 = scmp.ge.s32.totalorder %s39_s25, 2 }
  0x14   : > { %3150 = sst [smem:[#allocation6_spill]] %s2692_s2  ;;  %p2376_p1 = scmp.ge.s32.totalorder %s2692_s2, 1 }
  0x15   : > { %p722_p2 = scmp.lt.s32.totalorder %s2692_s2, 5  ;;  %s3194_s25 = smov (%p40_p0, %s39_s25), 0 }
  0x16   : > { %3151 = sst [smem:[#allocation7_spill]] %s3194_s25  ;;  %s3196_s3 = smov (!%p40_p0, %s42_s3), %s2688_s24 }
  0x17   : > { %p723_p3 = pnand %p2376_p1, %p722_p2  ;;  %p44_p4 = scmp.ge.s32.totalorder %s3196_s3, 2 }
  0x18   : > { %p842_p5 = scmp.lt.s32.totalorder (!%p723_p3), %s2680_s22, 1  ;;  %p850_p6 = scmp.lt.s32.totalorder (!%p723_p3), %s2676_s1, 1 }
  0x19   : > { %s3198_s3 = smov (%p44_p4, %s3196_s3), 0  ;;  %726 = sbr.rel (%p723_p3) target bundleno = 3180 (0xc6c), region = 100 }
  0x1a   : > { %3152 = sst [smem:[#allocation8_spill]] %s3198_s3  ;;  %s3153_s29 = sld [smem:[#allocation9_spill]] (!%p723_p3) }
  0x1b   : > { %s3158_s21 = sld [smem:[#allocation13_spill]] (!%p723_p3)  ;;  %s3159_s5 = sld [smem:[#allocation14_spill]] (!%p723_p3) }
  0x1c   : > { %s3160_s6 = sld [smem:[#allocation15_spill]] (!%p723_p3)  ;;  %s3161_s10 = sld [smem:[#allocation17_spill]] (!%p723_p3) }
  0x1d   : > { %s3166_s13 = sld [smem:[#allocation24_spill]] (!%p723_p3) }
  0x20   : > { %s3200_s22 = smov (!%p842_p5, %s2680_s22), 1 }
  0x21   : > { %s2840_s26 = scalar_select %p850_p6, %s2676_s1, 1 }
  0x22   : > { %s2842_s27 = sshll.u32 %s3200_s22, 3 }
  0x23   : > { %s845_s30 = scalar_lea.vmem %s3153_s29, %s2842_s27  ;;  %s2441_s17 = sshll.u32 %s2840_s26, 4 }
  0x24   : > { %s2868_s3 = scalar_lea.vmem %s3158_s21, %s2441_s17  ;;  %s2873_s24 = scalar_lea.vmem %s3159_s5, %s2441_s17 }
  0x25   : > { %s2878_s1 = scalar_lea.vmem %s3160_s6, %s2441_s17  ;;  %s2891_s19 = scalar_lea.vmem %s3161_s10, %s2441_s17 }
  0x26   : > { %s2908_s28 = scalar_lea.vmem %s3120_s14, %s2441_s17  ;;  %s901_s29 = scalar_lea.vmem %s3121_s15, %s2840_s26 }
  0x27   : > { %s2446_s10 = sshll.u32 %s2840_s26, 6  ;;  %s3164_s5 = sld [smem:[#allocation20_spill]] }
  0x28   : > { %s3165_s6 = sld [smem:[#allocation21_spill]]  ;;  %s913_s16 = scalar_lea.vmem %s3166_s13, %s2842_s27 }
  0x29   : > { %s3167_s17 = sld [smem:[#allocation3_spill]] }
  0x2d   : > { %s2918_s11 = scalar_lea.vmem %s3164_s5, %s2446_s10 }
  0x2e   : > { %s909_s7 = scalar_lea.vmem %s3165_s6, %s2840_s26 }
  0x2f   : > { %p2392_p7 = scmp.ne.s32.totalorder %s3167_s17, 0 }
  0x30   : > { %v919_v0 = vld [vmem:[%s845_s30] sm:$0xff] (!%p2392_p7)  ;;  %vm920_vm0 = vcmask (!%p2392_p7), 261120  }
  0x31   : > { %918 = sbr.rel (%p2392_p7) target bundleno = 56 (0x38), region = 104  ;;  %921 = vst.msk [vmem:[#allocation2] sm:$0xff] (!%p2392_p7), %vm920_vm0, %v919_v0 }
  0x38 PF: > { %v2929_v1 = vld [vmem:[#allocation2] sm:$0xff]  ;;  %vm926_vm1 = vcmask 261120   ;;  %v2694_v9 = vmov 0.0   ;;  %vm2695_vm2 = vmmov 0   ;;  %v2621_v10 = vld [vmem:[%s2868_s3 + $0x8] sm:$0xff]   ;;  %s3168_s10 = sld [smem:[#allocation11_spill]]  ;;  %s3172_s21 = scalar_lea.vmem %s3114_s8, %s2840_s26 }
  0x39   : > { %v927_v2 = vsel %vm926_vm1, %v2929_v1, 0.0  ;;  %v2620_v8 = vld [vmem:[%s2868_s3] sm:$0xff]   ;;  %2483 = vmatprep.subr.bf16.mxu1 %v2694_v9  ;;  %2487 = vmatprep.mubr.msk.bf16.mxu1 %vm2695_vm2, %v2694_v9  ;;  %s3170_s22 = sld [smem:[#allocation12_spill]]  ;;  %v2623_v22 = vld [vmem:[%s2873_s24 + $0x8] sm:$0xff]   ;;  %s3173_s23 = sld [smem:[#allocation16_spill]]  ;;  %v2697_v39 = vmov 0.0|0.0  }
  0x3a   : > { %928 = vadd.xlane.f32.xlu0 %v927_v2  ;;  %2484 = vmatpush3.bf16.msra.mxu1 %v2620_v8  ;;  %v2622_v20 = vld [vmem:[%s2873_s24] sm:$0xff]   ;;  %v2625_v24 = vld [vmem:[%s2878_s1 + $0x8] sm:$0xff]   ;;  %s2696_s18 = smov 112   ;;  %vm1223_vm3 = vcmask 130048   ;;  %s3175_s5 = sld [smem:[#allocation10_spill]]  ;;  %vm1372_vm4 = vcmask 64512  }
  0x3b   : > { %2485 = vmatprep.subr.bf16.mxu1 %v2694_v9  ;;  %v2624_v23 = vld [vmem:[%s2878_s1] sm:$0xff]   ;;  %s3177_s30 = scalar_lea.vmem %s3115_s9, %s2840_s26  ;;  %s3180_s1 = scalar_lea.vmem %s3118_s12, %s2840_s26 }
  0x3c   : > { %v2399_v29 = vld [vmem:[%s3172_s21] ss:$0 sm:$0xff] }
  0x3d   : > { %v2403_v56 = vld [vmem:[%s3177_s30] ss:$0 sm:$0xff] }
  0x3e   : > { %2486 = vmatpush3.bf16.msra.mxu1 %v2621_v10  ;;  %s3169_s13 = scalar_lea.vmem %s3168_s10, %s2840_s26 }
  0x3f   : > { %2491 = vmatprep.subr.bf16.mxu1 %v2694_v9  ;;  %v2393_v15 = vld [vmem:[%s3169_s13] ss:$0 sm:$0xff]  ;;  %s3171_s4 = scalar_lea.vmem %s3170_s22, %s2840_s26  ;;  %s3174_s2 = scalar_lea.vmem %s3173_s23, %s2840_s26 }
  0x40   : > { %v2394_v17 = vld [vmem:[%s3171_s4] ss:$0 sm:$0xff]  ;;  %s3176_s6 = scalar_lea.vmem %s3175_s5, %s2842_s27  ;;  %s3178_s4 = sld [smem:[#allocation18_spill]] }
  0x41   : > { %v2395_v33 = vld [vmem:[%s3174_s2] ss:$0 sm:$0xff]  ;;  %s3181_s23 = sld [smem:[#allocation19_spill]]  ;;  %s3184_s5 = sld [smem:[#allocation3_spill]] }
  0x42   : > { %v923_v51 = vld [vmem:[%s3176_s6] sm:$0xff] }
  0x46   : > { %s3179_s24 = scalar_lea.vmem %s3178_s4, %s2840_s26 }
  0x47   : > { %s3182_s2 = scalar_lea.vmem %s3181_s23, %s2840_s26  ;;  %p2436_p8 = scmp.ne.s32.totalorder %s3184_s5, 1 }
  0x48   : > { %s3185_s6 = sld [smem:[#allocation22_spill]] (!%p2436_p8)  ;;  %s3186_s30 = sld [smem:[#allocation23_spill]] (!%p2436_p8) }
  0xc7   : > { %v929_v3 = vpop.xlane.xlu0 %928 }
  0xc8   : > { %v931_v4 = vmul.f32 0.03125, %v929_v3 }
  0xca   : > { %v932_v5 = vsub.f32 %v2929_v1, %v931_v4 }
  0xcc   : > { %v933_v6 = vmul.f32 %v932_v5, %v932_v5 }
  0xce   : > { %v934_v7 = vsel %vm926_vm1, %v933_v6, 0.0 }
  0xcf   : > { %935 = vadd.xlane.f32.xlu0 %v934_v7 }
 0x15c   : > { %v936_v11 = vpop.xlane.xlu0 %935 }
 0x15d   : > { %v937_v12 = vmul.f32 0.03125, %v936_v11 }
 0x15f   : > { %v938_v13 = vadd.f32 1e-05, %v937_v12 }
 0x161   : > { %2638 = vrsqrt.f32 %v938_v13 }
 0x16b   : > { %v2639_v14 = vpop.eup %2638 }
 0x16c   : > { %v940_v16 = vmul.f32 %v2639_v14, %v932_v5 }
 0x16e   : > { %v947_v18 = vmul.f32 %v2393_v15, %v940_v16 }
 0x170   : > { %v954_v19 = vadd.f32 %v2394_v17, %v947_v18 }
 0x172   : > { %v955_v21 = vpack.c.bf16 %v954_v19, %v954_v19 }
 0x174   : > { %2488 = vmatmul.mubr.msk.bf16.vlgmr.msra.gmra.mrb[0].mxu1 %vm926_vm1, %v955_v21 }
 0x175   : > { %2492 = vmatpush3.bf16.msra.mxu1 %v2622_v20  ;;  %2495 = vmatprep.mubr.msk.bf16.mxu1 %vm2695_vm2, %v2694_v9 }
 0x176   : > { %2493 = vmatprep.subr.bf16.mxu1 %v2694_v9 }
 0x179   : > { %2494 = vmatpush3.bf16.msra.mxu1 %v2623_v22 }
 0x17a   : > { %2499 = vmatprep.subr.bf16.mxu1 %v2694_v9 }
 0x17c   : > { %2496 = vmatmul.mubr.msk.bf16.vlgmr.msra.gmra.mrb[4].mxu1 %vm926_vm1, %v955_v21 }
 0x17d   : > { %2500 = vmatpush3.bf16.msra.mxu1 %v2624_v23  ;;  %2503 = vmatprep.mubr.msk.bf16.mxu1 %vm2695_vm2, %v2694_v9 }
 0x17e   : > { %2501 = vmatprep.subr.bf16.mxu1 %v2694_v9 }
 0x181   : > { %2502 = vmatpush3.bf16.msra.mxu1 %v2625_v24 }
 0x182   : > { %2567 = vmatprep.subr.bf16.mxu1 %v2697_v39 }
 0x184   : > { %2504 = vmatmul.mubr.msk.bf16.vlgmr.msra.gmra.mrb[8].mxu1 %vm926_vm1, %v955_v21 }
 0x185   : > { %2511 = vmatprep.mubr.msk.f32.mxu1 %vm2695_vm2, %v2694_v9 }
 0x247   : > { %v1016_v25 = vpop.f32.mrb[0].mxu1 }
 0x248   : > { %v2489_v26 = vpop.f32.mrb[1].mxu1  ;;  %v1017_v36 = vadd.f32 %v2395_v33, %v1016_v25 }
 0x249   : > { %v1019_v27 = vpop.f32.mrb[2].mxu1  ;;  %v2626_v26 = vld [vmem:[%s2891_s19] sm:$0xff]  }
 0x24a   : > { %v2490_v28 = vpop.f32.mrb[3].mxu1  ;;  %v2698_v27 = vmov 1983009808  }
 0x24b   : > { %v1693_v28 = vunpack.c.l.s4 %v2698_v27 }
 0x24f   : > { %v1079_v30 = vpop.f32.mrb[4].mxu1 }
 0x250   : > { %v1080_v31 = vadd.f32 %v2399_v29, %v1079_v30  ;;  %v2497_v32 = vpop.f32.mrb[5].mxu1  ;;  %v1695_v29 = vlaneseq  ;;  %v1694_v30 = vunpack.c.0.s8 %v1693_v28  ;;  %v2421_v28 = vld [vmem:[%s3180_s1] ss:$0 sm:$0xff] }
 0x251   : > { %v1082_v34 = vpop.f32.mrb[6].mxu1  ;;  %v2699_v32 = vmov 1934713408  }
 0x252   : > { %1159 = vxpose.xlu0.b32.start.end [1/1] (short) (narrow) %v1080_v31, 16  ;;  %1152 = vrot.lane.b32.xlu1 %v1080_v31, %s2696_s18  ;;  %v2498_v35 = vpop.f32.mrb[7].mxu1  ;;  %v1696_v31 = vshrl.u32 %v1695_v29, 7  ;;  %v1724_v33 = vunpack.c.l.s4 %v2699_v32 }
 0x254   : > { %v1697_v35 = vsub.s32 %v1694_v30, %v1696_v31  ;;  %v2422_v30 = vld [vmem:[%s3182_s2] ss:$0 sm:$0xff] }
 0x256   : > { %1149 = vrot.lane.b32.xlu1 %v1017_v36, %s2696_s18 }
 0x257   : > { %v1142_v37 = vpop.f32.mrb[8].mxu1 }
 0x258   : > { %v2505_v38 = vpop.f32.mrb[9].mxu1  ;;  %v1143_v57 = vadd.f32 %v2403_v56, %v1142_v37  ;;  %v1725_v37 = vunpack.c.0.s8 %v1724_v33 }
 0x259   : > { %v1145_v40 = vpop.f32.mrb[10].mxu1 }
 0x25a   : > { %v2506_v41 = vpop.f32.mrb[11].mxu1 }
 0x25b   : > { %v1728_v41 = vsub.s32 %v1725_v37, %v1696_v31  ;;  %v2634_v37 = vld [vmem:[%s2918_s11 + $0x20] sm:$0xff]  }
 0x2c4   : > { %v1153_v42 = vpop.permute.xlu1 %1152 }
 0x2c5   : > { %1191 = vxpose.xlu1.b32.start.end [1/1] (short) (narrow) %v1153_v42, 16 }
 0x2c8   : > { %v1150_v46 = vpop.permute.xlu1 %1149 }
 0x2d2   : > { %v1175_v43 = vpop.trf.xlu0 }
 0x2d6   : > { %v1176_v44 = vpop.trf.xlu0 }
 0x2d7   : > { %v2568_v45 = vpack.c.bf16 %v1176_v44, %v1175_v43 }
 0x2d9   : > { %2569 = vmatpush3.bf16.msra.mxu1 %v2568_v45 }
 0x2da   : > { %2570 = vmatprep.subr.bf16.mxu1 %v2697_v39 }
 0x2dc   : > { %2512 = vmatmul.mubr.msk.f32.vlgmr.msra.gmra.mrb[12].mxu1 %vm1223_vm3, %v1017_v36 }
 0x2dd   : > { %2518 = vmatprep.mubr.msk.f32.mxu1 %vm2695_vm2, %v2694_v9 }
 0x345   : > { %v1207_v47 = vpop.trf.xlu1 }
 0x349   : > { %v1208_v48 = vpop.trf.xlu1 }
 0x34a   : > { %v2571_v49 = vpack.c.bf16 %v1208_v48, %v1207_v47  ;;  %v2627_v47 = vld [vmem:[%s2891_s19 + $0x8] sm:$0xff]   ;;  %s2700_s19 = smov 16  }
 0x34c   : > { %2572 = vmatpush3.bf16.msra.mxu1 %v2571_v49 }
 0x34f   : > { %2519 = vmatmul.mubr.msk.f32.vlgmr.msra.gmra.mrb[14].mxu1 %vm1223_vm3, %v1150_v46 }
 0x3af   : > { %v1292_v50 = vpop.f32.mrb[12].mxu1 }
 0x3b0   : > { %v1368_v52 = vmul.f32 0.25, %v1292_v50  ;;  %v2513_v53 = vpop.f32.mrb[13].mxu1 }
 0x3b2   : > { %v1370_v54 = vadd.f32 %v1368_v52, %v923_v51 }
 0x3b4   : > { %v1373_v55 = vsel %vm1372_vm4, %v1370_v54, -inf }
 0x3b5   : > { %1374 = vmax.xlane.f32.xlu1 %v1373_v55 }
 0x3c6   : > { %1156 = vrot.lane.b32.xlu1 %v1143_v57, %s2696_s18 }
 0x3ef   : > { %1395 = vxpose.xlu1.b32.start.end [1/1] (short) (narrow) %v1143_v57, 16 }
 0x422   : > { %v1364_v58 = vpop.f32.mrb[14].mxu1 }
 0x423   : > { %v1369_v59 = vmul.f32 0.25, %v1364_v58  ;;  %v2520_v60 = vpop.f32.mrb[15].mxu1 }
 0x425   : > { %v1371_v61 = vadd.f32 %v1369_v59, %v923_v51 }
 0x427   : > { %v1376_v62 = vsel %vm1372_vm4, %v1371_v61, -inf }
 0x428   : > { %1377 = vmax.xlane.f32.xlu0 %v1376_v62 }
 0x442   : > { %v1375_v63 = vpop.xlane.xlu1 %1374 }
 0x443   : > { %v1379_v0 = vsub.f32 %v1370_v54, %v1375_v63 }
 0x445   : > { %v1381_v2 = vmul.f32 1.442695, %v1379_v0 }
 0x446   : > { %v1157_v11 = vpop.permute.xlu1 %1156 }
 0x447   : > { %2640 = vpow2.f32 %v1381_v2 }
 0x451   : > { %v2641_v3 = vpop.eup %2640 }
 0x452   : > { %v1385_v4 = vsel %vm1372_vm4, %v2641_v3, 0.0 }
 0x453   : > { %1386 = vadd.xlane.f32.xlu0 %v1385_v4 }
 0x46f   : > { %v1411_v13 = vpop.trf.xlu1 }
 0x470   : > { %2523 = vmatprep.mubr.msk.f32.mxu0 %vm1372_vm4, %v1411_v13 }
 0x473   : > { %v1412_v16 = vpop.trf.xlu1 }
 0x4b5   : > { %v1378_v5 = vpop.xlane.xlu0 %1377 }
 0x4b6   : > { %v1380_v6 = vsub.f32 %v1371_v61, %v1378_v5 }
 0x4b8   : > { %v1383_v7 = vmul.f32 1.442695, %v1380_v6 }
 0x4ba   : > { %2642 = vpow2.f32 %v1383_v7 }
 0x4c4   : > { %v2643_v8 = vpop.eup %2642 }
 0x4c5   : > { %v1388_v10 = vsel %vm1372_vm4, %v2643_v8, 0.0 }
 0x4c6   : > { %1389 = vadd.xlane.f32.xlu0 %v1388_v10 }
 0x4e0   : > { %v1387_v12 = vpop.xlane.xlu0 %1386 }
 0x4e1   : > { %2644 = vrcp.f32 %v1387_v12 }
 0x4eb   : > { %v2645_v14 = vpop.eup %2644 }
 0x4ec   : > { %v1392_v15 = vmul.f32 %v2645_v14, %v2641_v3 }
 0x4ee   : > { %2521 = vmatprep.subr.msk.mxu0 %vm1372_vm4, %v1392_v15 }
 0x4ef   : > { %2522 = vmatpush3.xpose.msk.msra.mxu0 %vm1372_vm4, %v1392_v15 }
 0x4f0   : > { %2531 = vmatprep.subr.bf16.mxu0 %v2694_v9 }
 0x4f2   : > { %2524 = vmatmul.mubr.msk.f32.vlgmr.msra.gmra.mrb[0].mxu0 %vm1372_vm4, %v1412_v16 }
 0x4f3   : > { %1427 = vxpose.xlu0.b32.start.end [1/1] (short) (narrow) %v1157_v11, 16  ;;  %2535 = vmatprep.mubr.msk.bf16.mxu0 %vm2695_vm2, %v2694_v9 }
 0x4f4   : > { %2532 = vmatpush3.bf16.msra.mxu0 %v2626_v26 }
 0x4f5   : > { %2533 = vmatprep.subr.bf16.mxu0 %v2694_v9 }
 0x4f8   : > { %2534 = vmatpush3.bf16.msra.mxu0 %v2627_v47 }
 0x4f9   : > { %2547 = vmatprep.subr.bf16.mxu0 %v2694_v9 }
 0x553   : > { %v1390_v17 = vpop.xlane.xlu0 %1389 }
 0x554   : > { %2646 = vrcp.f32 %v1390_v17 }
 0x55e   : > { %v2647_v18 = vpop.eup %2646 }
 0x55f   : > { %v1394_v19 = vmul.f32 %v2647_v18, %v2643_v8  ;;  %v2417_v8 = vld [vmem:[%s3179_s24] ss:$0 sm:$0xff] }
 0x561   : > { %2526 = vmatprep.subr.msk.mxu1 %vm1372_vm4, %v1394_v19 }
 0x562   : > { %2527 = vmatpush3.xpose.msk.msra.mxu1 %vm1372_vm4, %v1394_v19 }
 0x563   : > { %2539 = vmatprep.subr.bf16.mxu1 %v2694_v9 }
 0x573   : > { %v1443_v20 = vpop.trf.xlu0 }
 0x574   : > { %2528 = vmatprep.mubr.msk.f32.mxu1 %vm1372_vm4, %v1443_v20 }
 0x577   : > { %v1444_v21 = vpop.trf.xlu0 }
 0x578   : > { %2529 = vmatmul.mubr.msk.f32.vlgmr.msra.gmra.mrb[16].mxu1 %vm1372_vm4, %v1444_v21 }
 0x579   : > { %2543 = vmatprep.mubr.msk.bf16.mxu1 %vm2695_vm2, %v2694_v9 }
 0x5c5   : > { %v2525_v22 = vpop.f32.mrb[0].mxu0 }
 0x5c6   : > { %v1534_v23 = vpop.f32.mrb[1].mxu0 }
 0x5c7   : > { %1627 = vxpose.xlu1.b32.start [1/2] (short) (narrow) %v1534_v23, 8  ;;  %v2630_v23 = vld [vmem:[%s2918_s11] sm:$0xff]  }
 0x5cb   : > { %1628 = vxpose.xlu1.b32.end [2/2] (short) (narrow) %v2525_v22, 8  ;;  %v2628_v22 = vld [vmem:[%s2908_s28] sm:$0xff]  }
 0x5cc   : > { %2540 = vmatpush3.bf16.msra.mxu1 %v2628_v22 }
 0x5cd   : > { %2541 = vmatprep.subr.bf16.mxu1 %v2694_v9 }
 0x647   : > { %v1643_v34 = vpop.trf.xlu1 }
 0x648   : > { %v1691_v36 = vcombine.high %v1643_v34, %v2694_v9  ;;  %v1698_v38 = vrot.slane %v1643_v34, %v1697_v35  ;;  %v2631_v34 = vld [vmem:[%s2918_s11 + $0x8] sm:$0xff]  }
 0x64a   : > { %v1705_v40 = vrot.slane %v1691_v36, %v1697_v35  ;;  %v2633_v36 = vld [vmem:[%s2918_s11 + $0x18] sm:$0xff]  }
 0x64b   : > { %v2530_v24 = vpop.f32.mrb[16].mxu1 }
 0x64c   : > { %v1618_v25 = vpop.f32.mrb[17].mxu1 }
 0x64d   : > { %1659 = vxpose.xlu0.b32.start [1/2] (short) (narrow) %v1618_v25, 8 }
 0x651   : > { %1660 = vxpose.xlu0.b32.end [2/2] (short) (narrow) %v2530_v24, 8 }
 0x6cd   : > { %v1675_v39 = vpop.trf.xlu0 }
 0x6ce   : > { %v1706_v42 = vcombine.high %v1675_v39, %v2694_v9  ;;  %v1713_v43 = vrot.slane %v1675_v39, %v1697_v35  ;;  %v2636_v39 = vld [vmem:[%s2918_s11 + $0x30] sm:$0xff]  }
 0x6d0   : > { %v1720_v44 = vrot.slane %v1706_v42, %v1697_v35  ;;  %v1721_v45 = vcombine.low %v1698_v38, %v1713_v43  ;;  %v1722_v46 = vcombine.high %v1698_v38, %v1713_v43  ;;  %v2635_v38 = vld [vmem:[%s2918_s11 + $0x28] sm:$0xff]  }
 0x6d2   : > { %v1729_v48 = vrot.slane %v1721_v45, %v1728_v41  ;;  %v1736_v49 = vrot.slane %v1722_v46, %v1728_v41  ;;  %v1737_v50 = vcombine.low %v1705_v40, %v1720_v44  ;;  %v1738_v51 = vcombine.high %v1705_v40, %v1720_v44  ;;  %v2637_v40 = vld [vmem:[%s2918_s11 + $0x38] sm:$0xff]  }
 0x6d4   : > { %v1745_v52 = vrot.slane %v1737_v50, %v1728_v41  ;;  %v1752_v53 = vrot.slane %v1738_v51, %v1728_v41  ;;  %v1757_v54 = vcombine.low %v1729_v48, %v1736_v49  ;;  %v2415_v55 = vcombine.high %v1729_v48, %v1736_v49 }
 0x6d6   : > { %v1764_v56 = vrot.slane %v1757_v54, %v1697_v35  ;;  %v1772_v57 = vrot.slane %v2415_v55, %v1697_v35  ;;  %v1773_v58 = vcombine.low %v1745_v52, %v1752_v53  ;;  %v2416_v59 = vcombine.high %v1745_v52, %v1752_v53 }
 0x6d8   : > { %v1780_v60 = vrot.slane %v1773_v58, %v1697_v35  ;;  %v1788_v61 = vrot.slane %v2416_v59, %v1697_v35  ;;  %v1789_v62 = vcombine.low %v1764_v56, %v1772_v57  ;;  %v2632_v35 = vld [vmem:[%s2918_s11 + $0x10] sm:$0xff]   ;;  %v2435_v57 = vld [vmem:[%s909_s7] ss:$0 sm:$0xff] }
 0x6da   : > { %v1797_v63 = vcombine.low %v1780_v60, %v1788_v61  ;;  %v1796_v0 = vrot.slane %v1789_v62, %v1728_v41 }
 0x6dc   : > { %v1804_v2 = vrot.slane %v1797_v63, %v1728_v41  ;;  %v2423_v41 = vld [vmem:[%s901_s29] ss:$0 sm:$0xff] }
 0x6de   : > { %v1806_v3 = vcombine.high %v1796_v0, %v1804_v2  ;;  %v1805_v4 = vcombine.low %v1796_v0, %v1804_v2 }
 0x6e0   : > { %1808 = vrot.lane.b32.xlu1 %v1806_v3, %s2700_s19 }
 0x752   : > { %v1809_v5 = vpop.permute.xlu1 %1808 }
 0x753   : > { %v1811_v6 = vsel %vm1223_vm3, %v1805_v4, %v1809_v5 }
 0x754   : > { %v1812_v7 = vpack.c.bf16 %v1811_v6, %v1811_v6 }
 0x756   : > { %2536 = vmatmul.mubr.msk.bf16.vlgmr.msra.gmra.mrb[4].mxu0 %vm926_vm1, %v1812_v7 }
 0x757   : > { %2563 = vmatprep.mubr.msk.bf16.mxu0 %vm2695_vm2, %v2694_v9  ;;  %2548 = vmatpush3.bf16.msra.mxu0 %v2630_v23 }
 0x758   : > { %2549 = vmatprep.subr.bf16.mxu0 %v2694_v9 }
 0x75b   : > { %2550 = vmatpush3.bf16.msra.mxu0 %v2631_v34 }
 0x75c   : > { %2551 = vmatprep.subr.bf16.mxu0 %v2694_v9 }
 0x75f   : > { %2552 = vmatpush3.bf16.msra.mxu0 %v2632_v35 }
 0x760   : > { %2553 = vmatprep.subr.bf16.mxu0 %v2694_v9 }
 0x763   : > { %2554 = vmatpush3.bf16.msra.mxu0 %v2633_v36 }
 0x764   : > { %2555 = vmatprep.subr.bf16.mxu0 %v2694_v9 }
 0x767   : > { %2556 = vmatpush3.bf16.msra.mxu0 %v2634_v37 }
 0x768   : > { %2557 = vmatprep.subr.bf16.mxu0 %v2694_v9 }
 0x76b   : > { %2558 = vmatpush3.bf16.msra.mxu0 %v2635_v38 }
 0x76c   : > { %2559 = vmatprep.subr.bf16.mxu0 %v2694_v9 }
 0x76f   : > { %2560 = vmatpush3.bf16.msra.mxu0 %v2636_v39 }
 0x770   : > { %2561 = vmatprep.subr.bf16.mxu0 %v2694_v9 }
 0x773   : > { %2562 = vmatpush3.bf16.msra.mxu0 %v2637_v40 }
 0x829   : > { %v1873_v10 = vpop.f32.mrb[4].mxu0 }
 0x82a   : > { %v1874_v11 = vadd.f32 %v2417_v8, %v1873_v10  ;;  %v2537_v12 = vpop.f32.mrb[5].mxu0 }
 0x82b   : > { %v1876_v13 = vpop.f32.mrb[6].mxu0 }
 0x82c   : > { %v3029_v14 = vadd.f32 %v1874_v11, %v2929_v1  ;;  %v2538_v15 = vpop.f32.mrb[7].mxu0  ;;  %v2629_v1 = vld [vmem:[%s2908_s28 + $0x8] sm:$0xff]   ;;  %v2437_v11 = vld [vmem:[%s3185_s6] ss:$0 sm:$0xff] (!%p2436_p8) }
 0x82d   : > { %2542 = vmatpush3.bf16.msra.mxu1 %v2629_v1  ;;  %v2438_v13 = vld [vmem:[%s3186_s30] ss:$0 sm:$0xff] (!%p2436_p8) }
 0x82e   : > { %v1882_v16 = vsel %vm926_vm1, %v3029_v14, 0.0 }
 0x82f   : > { %1883 = vadd.xlane.f32.xlu0 %v1882_v16 }
 0x8bc   : > { %v1884_v17 = vpop.xlane.xlu0 %1883 }
 0x8bd   : > { %v1885_v18 = vmul.f32 0.03125, %v1884_v17 }
 0x8bf   : > { %v1886_v19 = vsub.f32 %v3029_v14, %v1885_v18 }
 0x8c1   : > { %v1887_v20 = vmul.f32 %v1886_v19, %v1886_v19 }
 0x8c3   : > { %v1888_v21 = vsel %vm926_vm1, %v1887_v20, 0.0 }
 0x8c4   : > { %1889 = vadd.xlane.f32.xlu1 %v1888_v21 }
 0x951   : > { %v1890_v24 = vpop.xlane.xlu1 %1889 }
 0x952   : > { %v1891_v25 = vmul.f32 0.03125, %v1890_v24 }
 0x954   : > { %v1892_v26 = vadd.f32 1e-05, %v1891_v25 }
 0x956   : > { %2648 = vrsqrt.f32 %v1892_v26 }
 0x960   : > { %v2649_v27 = vpop.eup %2648 }
 0x961   : > { %v1894_v29 = vmul.f32 %v2649_v27, %v1886_v19 }
 0x963   : > { %v1901_v31 = vmul.f32 %v2421_v28, %v1894_v29 }
 0x965   : > { %v1908_v32 = vadd.f32 %v2422_v30, %v1901_v31 }
 0x967   : > { %v1909_v33 = vpack.c.bf16 %v1908_v32, %v1908_v32 }
 0x969   : > { %2544 = vmatmul.mubr.msk.bf16.vlgmr.msra.gmra.mrb[20].mxu1 %vm926_vm1, %v1909_v33 }
 0xa3c   : > { %v1970_v42 = vpop.f32.mrb[20].mxu1 }
 0xa3d   : > { %v1971_v43 = vadd.f32 %v2423_v41, %v1970_v42  ;;  %v2545_v44 = vpop.f32.mrb[21].mxu1 }
 0xa3e   : > { %v1973_v45 = vpop.f32.mrb[22].mxu1 }
 0xa3f   : > { %v1977_v46 = vmul.f32 0.044715, %v1971_v43  ;;  %v2546_v47 = vpop.f32.mrb[23].mxu1  ;;  %v1976_v9 = vmul.f32 0.5, %v1971_v43 }
 0xa41   : > { %v1978_v48 = vmul.f32 %v1977_v46, %v1971_v43 }
 0xa43   : > { %v1979_v49 = vmul.f32 %v1978_v48, %v1971_v43 }
 0xa45   : > { %v1980_v50 = vadd.f32 %v1979_v49, %v1971_v43 }
 0xa47   : > { %v1981_v51 = vmul.f32 0.7978846, %v1980_v50 }
 0xa49   : > { %2650 = vtanh.f32 %v1981_v51 }
 0xa53   : > { %v2651_v52 = vpop.eup %2650 }
 0xa54   : > { %v1983_v53 = vadd.f32 1.0, %v2651_v52 }
 0xa56   : > { %v1984_v54 = vmul.f32 %v1983_v53, %v1976_v9 }
 0xa58   : > { %v1985_v55 = vpack.c.bf16 %v1984_v54, %v1984_v54 }
 0xa5a   : > { %2564 = vmatmul.mubr.bf16.vlgmr.msra.gmra.mrb[8].mxu0 %v1985_v55 }
 0xb2c   : > { %2103 = sbr.rel (%p2436_p8) target bundleno = 3180 (0xc6c), region = 108 }
 0xb2d   : > { %v2084_v56 = vpop.f32.mrb[8].mxu0 }
 0xb2e   : > { %v2090_v58 = vadd.f32 %v2084_v56, %v3029_v14  ;;  %v2565_v59 = vpop.f32.mrb[9].mxu0 }
 0xb2f   : > { %v2087_v60 = vpop.f32.mrb[10].mxu0 }
 0xb30   : > { %v2098_v61 = vadd.f32 %v2435_v57, %v2090_v58  ;;  %v2566_v62 = vpop.f32.mrb[11].mxu0 }
 0xb32   : > { %2099 = vst.msk [vmem:[#allocation2] sm:$0xff] %vm926_vm1, %v2098_v61  ;;  %v2106_v63 = vsel (!%p2436_p8), %vm926_vm1, %v2098_v61, 0.0 }
 0xb33   : > { %2107 = vadd.xlane.f32.xlu0 %v2106_v63 }
 0xbc0   : > { %v2108_v0 = vpop.xlane.xlu0 %2107 }
 0xbc1   : > { %v2109_v2 = vmul.f32 0.03125, %v2108_v0 }
 0xbc3   : > { %v2110_v3 = vsub.f32 %v2098_v61, %v2109_v2 }
 0xbc5   : > { %v2111_v4 = vmul.f32 %v2110_v3, %v2110_v3 }
 0xbc7   : > { %v2112_v5 = vsel %vm926_vm1, %v2111_v4, 0.0 }
 0xbc8   : > { %2113 = vadd.xlane.f32.xlu0 %v2112_v5 }
 0xc55   : > { %v2114_v6 = vpop.xlane.xlu0 %2113 }
 0xc56   : > { %v2115_v7 = vmul.f32 0.03125, %v2114_v6 }
 0xc58   : > { %v2116_v8 = vadd.f32 1e-05, %v2115_v7 }
 0xc5a   : > { %2652 = vrsqrt.f32 %v2116_v8 }
 0xc64   : > { %v2653_v10 = vpop.eup %2652 }
 0xc65   : > { %v2118_v12 = vmul.f32 %v2653_v10, %v2110_v3 }
 0xc67   : > { %v2125_v14 = vmul.f32 %v2437_v11, %v2118_v12 }
 0xc69   : > { %v2132_v15 = vadd.f32 %v2438_v13, %v2125_v14 }
 0xc6b   : > { %2133 = vst.msk [vmem:[%s913_s16] sm:$0xff] %vm926_vm1, %v2132_v15 }
 0xc6c PF: > { %s3188_s4 = sld [smem:[#allocation6_spill]]  ;;  %s3189_s1 = sld [smem:[#allocation4_spill]] }
 0xc6d   : > { %s3190_s22 = sld [smem:[#allocation5_spill]]  ;;  %s3191_s23 = sld [smem:[#allocation7_spill]] }
 0xc6e   : > { %s3192_s24 = sld [smem:[#allocation8_spill]] }
 0xc72   : > { %s30_s2 = sadd.s32 1, %s3188_s4  }
 0xc73   : > { %p27_p9 = scmp.ge.s32.totalorder %s30_s2, 6  }
 0xc75   :  { %29 = sbr.rel (!%p27_p9) target bundleno = 17 (0x11), region = 189 }

</bundles_post_ra>
